<compile_context>
chip_gen: v5e
topology: v5e:2x2
jax: 0.10.0
libtpu: 0.0.40
codegen_flags: <defaults>
</compile_context>

<pallas_src>
import math
import numpy as np
import jax
import jax.numpy as jnp
from jax.experimental import pallas as pl
from jax.experimental.pallas import tpu as pltpu


# ----------------------------------------------------------------------------
# Model configuration (small, deterministic, consistent with the module)
# ----------------------------------------------------------------------------
CFG = dict(
    num_nodes=16,     # N
    input_dim=2,      # encoder input features
    output_dim=1,
    ycov_dim=1,
    horizon=3,
    rnn_units=32,     # H
    rnn_layers=1,
    embed_dim=8,
    cheb_k=3,         # K
    seq_len=8,        # T
    batch=2,          # B
)


# ----------------------------------------------------------------------------
# In-kernel helpers (pure jnp on VMEM-resident values / refs)
# ----------------------------------------------------------------------------
def _row_softmax_relu(e):
    """softmax(relu(e @ e^T), axis=-1) for an (N, D) embedding tile."""
    logits = jax.lax.dot_general(e, e, (((1,), (1,)), ((), ())),
                                 preferred_element_type=jnp.float32)
    logits = jnp.maximum(logits, 0.0)
    logits = logits - jnp.max(logits, axis=-1, keepdims=True)
    ex = jnp.exp(logits)
    return ex / jnp.sum(ex, axis=-1, keepdims=True)


def _block_diag(blocks):
    """Block-diagonal assembly of B square (N, N) blocks -> (B*N, B*N)."""
    nb = len(blocks)
    if nb == 1:
        return blocks[0]
    rows = []
    for i, blk in enumerate(blocks):
        row = [blk if j == i else jnp.zeros_like(blk) for j in range(nb)]
        rows.append(jnp.concatenate(row, axis=-1))
    return jnp.concatenate(rows, axis=0)


def _write_cheb(cheb_ref, a2, K, BN):
    """Write [I, A, 2A T_{k-1} - T_{k-2}, ...] (block-diagonal) into scratch."""
    rows = jax.lax.broadcasted_iota(jnp.int32, (BN, BN), 0)
    cols = jax.lax.broadcasted_iota(jnp.int32, (BN, BN), 1)
    eye = (rows == cols).astype(jnp.float32)
    cheb_ref[0] = eye
    if K > 1:
        cheb_ref[1] = a2
    t_prev2, t_prev = eye, a2
    for k in range(2, K):
        t_k = 2.0 * jnp.dot(a2, t_prev, preferred_element_type=jnp.float32) - t_prev2
        cheb_ref[k] = t_k
        t_prev2, t_prev = t_prev, t_k


def _agcrn_cell(xin, s, cheb_ref, K, H, gw, gb, uw, ub):
    """One AGCRN (graph-GRU) step on row-stacked batch (BN, *) tiles.

    xin : (BN, Din)   s : (BN, H)   cheb_ref : (K, BN, BN) block-diagonal
    gw  : (K*(Din+H), 2H)  uw : (K*(Din+H), H)
    """
    xs = jnp.concatenate([xin, s], axis=-1)                            # (BN, C)
    xg = jnp.concatenate(
        [jnp.dot(cheb_ref[k], xs, preferred_element_type=jnp.float32)
         for k in range(K)], axis=-1)                                  # (BN, K*C)
    zr = jax.nn.sigmoid(jnp.dot(xg, gw, preferred_element_type=jnp.float32) + gb)
    z, r = zr[:, :H], zr[:, H:]
    cand = jnp.concatenate([xin, z * s], axis=-1)                      # (BN, C)
    cg = jnp.concatenate(
        [jnp.dot(cheb_ref[k], cand, preferred_element_type=jnp.float32)
         for k in range(K)], axis=-1)
    hc = jnp.tanh(jnp.dot(cg, uw, preferred_element_type=jnp.float32) + ub)
    return r * s + (1.0 - r) * hc


# ----------------------------------------------------------------------------
# Single fused kernel: grid over (T encoder steps + horizon decoder steps)
# ----------------------------------------------------------------------------
def _make_fused_kernel(B, N, K, H, L, T, horizon):
    BN = B * N

    def kernel(x_ref, ycov_ref, emb_ref, hw_ref, hb_ref, *rest):
        enc_refs = rest[:4 * L]
        dec_refs = rest[4 * L:8 * L]
        pw_ref = rest[8 * L]
        pb_ref = rest[8 * L + 1]
        out_ref = rest[8 * L + 2]
        cheb_ref = rest[8 * L + 3]
        state_ref = rest[8 * L + 4]
        go_ref = rest[8 * L + 5]

        t = pl.program_id(0)

        # ---- encoder init: shared adaptive graph + zero hidden state --------
        @pl.when(t == 0)
        def _init_encoder():
            a = _row_softmax_relu(emb_ref[...])          # (N, N), shared across batch
            a2 = _block_diag([a] * B)                    # (BN, BN)
            _write_cheb(cheb_ref, a2, K, BN)
            state_ref[...] = jnp.zeros_like(state_ref)

        # ---- encoder step ----------------------------------------------------
        @pl.when(t < T)
        def _encoder_step():
            xin = x_ref[t]                               # (BN, Din)
            for i in range(L):
                gw = enc_refs[4 * i][...]
                gb = enc_refs[4 * i + 1][...]
                uw = enc_refs[4 * i + 2][...]
                ub = enc_refs[4 * i + 3][...]
                h = _agcrn_cell(xin, state_ref[i], cheb_ref, K, H, gw, gb, uw, ub)
                state_ref[i] = h
                xin = h

        # ---- decoder init: hypernet -> per-batch adaptive graph --------------
        @pl.when(t == T)
        def _init_decoder():
            h_t = state_ref[L - 1]                                        # (BN, H)
            ne = jnp.dot(h_t, hw_ref[...],
                         preferred_element_type=jnp.float32) + hb_ref[...]  # (BN, E)
            sups = [_row_softmax_relu(ne[b * N:(b + 1) * N]) for b in range(B)]
            a2 = _block_diag(sups)                                        # (BN, BN)
            _write_cheb(cheb_ref, a2, K, BN)
            for i in range(L - 1):                                        # ht_list = [h_t] * L
                state_ref[i] = h_t
            go_ref[...] = jnp.zeros_like(go_ref)

        # ---- decoder step -----------------------------------------------------
        @pl.when(t >= T)
        def _decoder_step():
            td = t - T
            xin = jnp.concatenate([go_ref[...], ycov_ref[td]], axis=-1)   # (BN, Dout+Cy)
            for i in range(L):
                gw = dec_refs[4 * i][...]
                gb = dec_refs[4 * i + 1][...]
                uw = dec_refs[4 * i + 2][...]
                ub = dec_refs[4 * i + 3][...]
                h = _agcrn_cell(xin, state_ref[i], cheb_ref, K, H, gw, gb, uw, ub)
                state_ref[i] = h
                xin = h
            go = jnp.dot(xin, pw_ref[...],
                         preferred_element_type=jnp.float32) + pb_ref[...]
            go_ref[...] = go
            out_ref[td] = go
            # TODO(synk): training-time curriculum learning (np.random scheduled
            # sampling with labels) omitted — inference path only.

    return kernel


# ----------------------------------------------------------------------------
# Full DGCRN forward (inference path: labels=None) — exactly 1 pallas_call
# ----------------------------------------------------------------------------
def dgcrn_forward(params, x, y_cov, cfg):
    B, T, N, Din = x.shape
    horizon, Cy = y_cov.shape[1], y_cov.shape[-1]
    H, K, L = cfg["rnn_units"], cfg["cheb_k"], cfg["rnn_layers"]
    E, Dout = cfg["embed_dim"], cfg["output_dim"]
    BN = B * N

    x_r = jnp.transpose(x, (1, 0, 2, 3)).reshape(T, BN, Din)
    yc = jnp.transpose(y_cov, (1, 0, 2, 3)).reshape(horizon, BN, Cy)

    in_specs = [
        pl.BlockSpec((T, BN, Din), lambda t: (0, 0, 0)),
        pl.BlockSpec((horizon, BN, Cy), lambda t: (0, 0, 0)),
        pl.BlockSpec((N, E), lambda t: (0, 0)),
        pl.BlockSpec((H, E), lambda t: (0, 0)),
        pl.BlockSpec((1, E), lambda t: (0, 0)),
    ]
    args = [x_r, yc, params["node_embeddings"],
            params["hyper_w"], params["hyper_b"].reshape(1, E)]

    for branch, din0 in (("encoder", Din), ("decoder", Dout + Cy)):
        for i in range(L):
            p = params[branch][i]
            din_i = din0 if i == 0 else H
            C = din_i + H
            args += [p["gate_w"], p["gate_b"].reshape(1, 2 * H),
                     p["upd_w"], p["upd_b"].reshape(1, H)]
            in_specs += [
                pl.BlockSpec((K * C, 2 * H), lambda t: (0, 0)),
                pl.BlockSpec((1, 2 * H), lambda t: (0, 0)),
                pl.BlockSpec((K * C, H), lambda t: (0, 0)),
                pl.BlockSpec((1, H), lambda t: (0, 0)),
            ]

    args += [params["proj_w"], params["proj_b"].reshape(1, Dout)]
    in_specs += [
        pl.BlockSpec((H, Dout), lambda t: (0, 0)),
        pl.BlockSpec((1, Dout), lambda t: (0, 0)),
    ]

    out = pl.pallas_call(
        _make_fused_kernel(B, N, K, H, L, T, horizon),
        out_shape=jax.ShapeDtypeStruct((horizon, BN, Dout), jnp.float32),
        grid=(T + horizon,),
        in_specs=in_specs,
        # Output block index is constant across the grid -> resident in VMEM,
        # written back to HBM once at the end of the grid.
        out_specs=pl.BlockSpec((horizon, BN, Dout), lambda t: (0, 0, 0)),
        scratch_shapes=[
            pltpu.VMEM((K, BN, BN), jnp.float32),    # block-diag Chebyshev stack
            pltpu.VMEM((L, BN, H), jnp.float32),     # per-layer recurrent state
            pltpu.VMEM((BN, Dout), jnp.float32),     # go (autoregressive input)
        ],
        compiler_params=pltpu.CompilerParams(dimension_semantics=("arbitrary",)),
    )(*args)

    output = out.reshape(horizon, B, N, Dout).transpose(1, 0, 2, 3)
    # TODO(synk): get_unsupervised_loss / filter_negative branch (labels is not None)
    # is training-only and not implemented.
    return output, None


# ----------------------------------------------------------------------------
# Deterministic parameter init (mirrors __init__ shapes of the PyTorch module)
# ----------------------------------------------------------------------------
def init_params(cfg, key):
    N, E, H, K, L = (cfg["num_nodes"], cfg["embed_dim"], cfg["rnn_units"],
                     cfg["cheb_k"], cfg["rnn_layers"])
    keys = iter(jax.random.split(key, 64))

    def xavier(k, shape):
        std = math.sqrt(2.0 / (shape[0] + shape[1]))
        return (std * jax.random.normal(k, shape)).astype(jnp.float32)

    def make_cell(dim_in):
        C = dim_in + H
        return dict(
            dim_in=dim_in,
            gate_w=xavier(next(keys), (K * C, 2 * H)),
            gate_b=jnp.zeros((2 * H,), jnp.float32),
            upd_w=xavier(next(keys), (K * C, H)),
            upd_b=jnp.zeros((H,), jnp.float32),
        )

    return dict(
        node_embeddings=jax.random.normal(next(keys), (N, E)).astype(jnp.float32),
        encoder=[make_cell(cfg["input_dim"] if i == 0 else H) for i in range(L)],
        decoder=[make_cell((cfg["output_dim"] + cfg["ycov_dim"]) if i == 0 else H)
                 for i in range(L)],
        hyper_w=xavier(next(keys), (H, E)),
        hyper_b=jnp.zeros((E,), jnp.float32),
        proj_w=xavier(next(keys), (H, cfg["output_dim"])),
        proj_b=jnp.zeros((cfg["output_dim"],), jnp.float32),
    )


# ----------------------------------------------------------------------------
# Pure-JAX reference (mirrors the PyTorch concat-based formulation)
# ----------------------------------------------------------------------------
def _ref_agcn(x, graphs, W, b):
    K = graphs.shape[-3]
    xg = []
    for k in range(K):
        if graphs.ndim == 3:
            xg.append(jnp.einsum("nm,bmc->bnc", graphs[k], x))
        else:
            xg.append(jnp.einsum("bnm,bmc->bnc", graphs[:, k], x))
    xg = jnp.concatenate(xg, axis=-1)
    return jnp.einsum("bni,io->bno", xg, W) + b


def _ref_cell(x, state, graphs, p, H):
    xs = jnp.concatenate([x, state], axis=-1)
    zr = jax.nn.sigmoid(_ref_agcn(xs, graphs, p["gate_w"], p["gate_b"]))
    z, r = zr[..., :H], zr[..., H:]
    cand = jnp.concatenate([x, z * state], axis=-1)
    hc = jnp.tanh(_ref_agcn(cand, graphs, p["upd_w"], p["upd_b"]))
    return r * state + (1.0 - r) * hc


def _ref_cheb(A, K):
    if A.ndim == 2:
        N = A.shape[0]
        gs = [jnp.eye(N, dtype=A.dtype), A]
        for _ in range(2, K):
            gs.append(2.0 * A @ gs[-1] - gs[-2])
        return jnp.stack(gs)
    B, N = A.shape[0], A.shape[1]
    eye = jnp.broadcast_to(jnp.eye(N, dtype=A.dtype), (B, N, N))
    gs = [eye, A]
    for _ in range(2, K):
        gs.append(2.0 * jnp.einsum("bij,bjk->bik", A, gs[-1]) - gs[-2])
    return jnp.stack(gs, axis=1)


def ref_forward(params, x, y_cov, cfg):
    B, T, N, _ = x.shape
    K, H, L = cfg["cheb_k"], cfg["rnn_units"], cfg["rnn_layers"]
    E = params["node_embeddings"]
    sup = jax.nn.softmax(jax.nn.relu(E @ E.T), axis=1)
    g_en = _ref_cheb(sup, K)
    cur = x
    for i in range(L):
        p = params["encoder"][i]
        st = jnp.zeros((B, N, H), jnp.float32)
        steps = []
        for t in range(T):
            st = _ref_cell(cur[:, t], st, g_en, p, H)
            steps.append(st)
        cur = jnp.stack(steps, axis=1)
    h_t = cur[:, -1]
    ht_list = [h_t] * L
    ne = jnp.einsum("bnc,co->bno", h_t, params["hyper_w"]) + params["hyper_b"]
    sup_de = jax.nn.softmax(jax.nn.relu(jnp.einsum("bnc,bmc->bnm", ne, ne)), axis=-1)
    g_de = _ref_cheb(sup_de, K)
    go = jnp.zeros((B, N, cfg["output_dim"]), jnp.float32)
    outs = []
    for t in range(cfg["horizon"]):
        xt = jnp.concatenate([go, y_cov[:, t]], axis=-1)
        new_ht = []
        c = xt
        for i in range(L):
            c = _ref_cell(c, ht_list[i], g_de, params["decoder"][i], H)
            new_ht.append(c)
        ht_list = new_ht
        go = jnp.einsum("bnc,co->bno", c, params["proj_w"]) + params["proj_b"]
        outs.append(go)
    return jnp.stack(outs, axis=1), None


# ----------------------------------------------------------------------------
if __name__ == "__main__":
    key = jax.random.PRNGKey(0)
    kp, kx, ky = jax.random.split(key, 3)
    params = init_params(CFG, kp)

    B, T, N = CFG["batch"], CFG["seq_len"], CFG["num_nodes"]
    x = jax.random.normal(kx, (B, T, N, CFG["input_dim"]), jnp.float32)
    y_cov = jax.random.normal(ky, (B, CFG["horizon"], N, CFG["ycov_dim"]), jnp.float32)

    fwd = jax.jit(lambda p, xx, yy: dgcrn_forward(p, xx, yy, CFG))
    out, _ = fwd(params, x, y_cov)
    out = jax.block_until_ready(out)
    assert out.shape == (B, CFG["horizon"], N, CFG["output_dim"])

    with jax.default_matmul_precision("highest"):
        ref, _ = ref_forward(params, x, y_cov, CFG)
    ref = jax.block_until_ready(ref)

    np.testing.assert_allclose(np.asarray(out), np.asarray(ref), rtol=2e-2, atol=2e-2)
    print("KERNEL_OK")
</pallas_src>

<mosaic_0001>
module attributes {stable_mosaic.version = 11 : i64} {
  func.func @kernel(%arg0: i32, %arg1: memref<8x32x2xf32, #tpu.memory_space<vmem>>, %arg2: memref<3x32x1xf32, #tpu.memory_space<vmem>>, %arg3: memref<16x8xf32, #tpu.memory_space<vmem>>, %arg4: memref<32x8xf32, #tpu.memory_space<vmem>>, %arg5: memref<1x8xf32, #tpu.memory_space<vmem>>, %arg6: memref<102x64xf32, #tpu.memory_space<vmem>>, %arg7: memref<1x64xf32, #tpu.memory_space<vmem>>, %arg8: memref<102x32xf32, #tpu.memory_space<vmem>>, %arg9: memref<1x32xf32, #tpu.memory_space<vmem>>, %arg10: memref<102x64xf32, #tpu.memory_space<vmem>>, %arg11: memref<1x64xf32, #tpu.memory_space<vmem>>, %arg12: memref<102x32xf32, #tpu.memory_space<vmem>>, %arg13: memref<1x32xf32, #tpu.memory_space<vmem>>, %arg14: memref<32x1xf32, #tpu.memory_space<vmem>>, %arg15: memref<1x1xf32, #tpu.memory_space<vmem>>, %arg16: memref<3x32x1xf32, #tpu.memory_space<vmem>>, %arg17: memref<3x32x32xf32, #tpu.memory_space<vmem>>, %arg18: memref<1x32x32xf32, #tpu.memory_space<vmem>>, %arg19: memref<32x1xf32, #tpu.memory_space<vmem>>) attributes {dimension_semantics = [#tpu.dimension_semantics<arbitrary>], iteration_bounds = array<i64: 11>, scalar_prefetch = 0 : i64, scratch_operands = 3 : i64, tpu.core_type = #tpu.core_type<tc>, window_params = [{pipeline_mode = #tpu.pipeline_mode<synchronous>, transform_indices = @transform_0, window_bounds = array<i64: 8, 32, 2>}, {pipeline_mode = #tpu.pipeline_mode<synchronous>, transform_indices = @transform_1, window_bounds = array<i64: 3, 32, 1>}, {pipeline_mode = #tpu.pipeline_mode<synchronous>, transform_indices = @transform_2, window_bounds = array<i64: 16, 8>}, {pipeline_mode = #tpu.pipeline_mode<synchronous>, transform_indices = @transform_3, window_bounds = array<i64: 32, 8>}, {pipeline_mode = #tpu.pipeline_mode<synchronous>, transform_indices = @transform_4, window_bounds = array<i64: 1, 8>}, {pipeline_mode = #tpu.pipeline_mode<synchronous>, transform_indices = @transform_5, window_bounds = array<i64: 102, 64>}, {pipeline_mode = #tpu.pipeline_mode<synchronous>, transform_indices = @transform_6, window_bounds = array<i64: 1, 64>}, {pipeline_mode = #tpu.pipeline_mode<synchronous>, transform_indices = @transform_7, window_bounds = array<i64: 102, 32>}, {pipeline_mode = #tpu.pipeline_mode<synchronous>, transform_indices = @transform_8, window_bounds = array<i64: 1, 32>}, {pipeline_mode = #tpu.pipeline_mode<synchronous>, transform_indices = @transform_9, window_bounds = array<i64: 102, 64>}, {pipeline_mode = #tpu.pipeline_mode<synchronous>, transform_indices = @transform_10, window_bounds = array<i64: 1, 64>}, {pipeline_mode = #tpu.pipeline_mode<synchronous>, transform_indices = @transform_11, window_bounds = array<i64: 102, 32>}, {pipeline_mode = #tpu.pipeline_mode<synchronous>, transform_indices = @transform_12, window_bounds = array<i64: 1, 32>}, {pipeline_mode = #tpu.pipeline_mode<synchronous>, transform_indices = @transform_13, window_bounds = array<i64: 32, 1>}, {pipeline_mode = #tpu.pipeline_mode<synchronous>, transform_indices = @transform_14, window_bounds = array<i64: 1, 1>}, {pipeline_mode = #tpu.pipeline_mode<synchronous>, transform_indices = @transform_15, window_bounds = array<i64: 3, 32, 1>}]} {
    %c0_i32 = arith.constant 0 : i32
    %0 = arith.cmpi eq, %arg0, %c0_i32 : i32
    %1 = arith.extui %0 : i1 to i32
    %c0_i32_0 = arith.constant 0 : i32
    %2 = arith.cmpi ne, %1, %c0_i32_0 : i32
    scf.if %2 {
      %c0 = arith.constant 0 : index
      %c0_6 = arith.constant 0 : index
      %12 = vector.load %arg3[%c0, %c0_6] : memref<16x8xf32, #tpu.memory_space<vmem>>, vector<16x8xf32>
      %cst = arith.constant dense<0.000000e+00> : vector<16x16xf32>
      %13 = tpu.matmul %12, %12, %cst {dimension_numbers = #tpu.dot_dimension_numbers<[1], [1], [0], [0], [0, 0, 1, 0], [], []>} : vector<16x8xf32>, vector<16x8xf32>, vector<16x16xf32> -> vector<16x16xf32>
      %cst_7 = arith.constant 0.000000e+00 : f32
      %14 = vector.broadcast %cst_7 : f32 to vector<16x16xf32>
      %15 = arith.maximumf %13, %14 : vector<16x16xf32>
      %cst_8 = arith.constant dense<0xFF800000> : vector<16xf32>
      %16 = vector.multi_reduction <maximumf>, %15, %cst_8 [1] : vector<16x16xf32> to vector<16xf32>
      %17 = vector.shape_cast %16 : vector<16xf32> to vector<16x1xf32>
      %18 = vector.broadcast %17 : vector<16x1xf32> to vector<16x16xf32>
      %19 = arith.subf %15, %18 : vector<16x16xf32>
      %20 = math.exp %19 : vector<16x16xf32>
      %cst_9 = arith.constant dense<0.000000e+00> : vector<16xf32>
      %21 = vector.multi_reduction <add>, %20, %cst_9 [1] : vector<16x16xf32> to vector<16xf32>
      %22 = vector.shape_cast %21 : vector<16xf32> to vector<16x1xf32>
      %23 = vector.broadcast %22 : vector<16x1xf32> to vector<16x16xf32>
      %24 = arith.divf %20, %23 : vector<16x16xf32>
      %cst_10 = arith.constant 0.000000e+00 : f32
      %25 = vector.broadcast %cst_10 : f32 to vector<16x16xf32>
      %26 = tpu.concatenate %24, %25 in 1 : vector<16x16xf32>, vector<16x16xf32> -> vector<16x32xf32>
      %cst_11 = arith.constant 0.000000e+00 : f32
      %27 = vector.broadcast %cst_11 : f32 to vector<16x16xf32>
      %28 = tpu.concatenate %27, %24 in 1 : vector<16x16xf32>, vector<16x16xf32> -> vector<16x32xf32>
      %29 = tpu.concatenate %26, %28 in 0 : vector<16x32xf32>, vector<16x32xf32> -> vector<32x32xf32>
      %30 = tpu.iota {dimensions = array<i32: 0>} : vector<32x32xi32>
      %31 = tpu.iota {dimensions = array<i32: 1>} : vector<32x32xi32>
      %32 = arith.cmpi eq, %30, %31 : vector<32x32xi32>
      %33 = arith.extui %32 : vector<32x32xi1> to vector<32x32xi32>
      %34 = arith.sitofp %33 : vector<32x32xi32> to vector<32x32xf32>
      %c0_12 = arith.constant 0 : index
      %c0_13 = arith.constant 0 : index
      %c0_14 = arith.constant 0 : index
      %35 = vector.load %arg17[%c0_12, %c0_13, %c0_14] : memref<3x32x32xf32, #tpu.memory_space<vmem>>, vector<1x32x32xf32>
      %36 = vector.shape_cast %35 : vector<1x32x32xf32> to vector<32x32xf32>
      %37 = vector.shape_cast %34 : vector<32x32xf32> to vector<1x32x32xf32>
      tpu.vector_store %arg17[%c0_12, %c0_13, %c0_14], %37 {strides = array<i32>} : memref<3x32x32xf32, #tpu.memory_space<vmem>>, vector<1x32x32xf32>,
      %c1 = arith.constant 1 : index
      %c0_15 = arith.constant 0 : index
      %c0_16 = arith.constant 0 : index
      %38 = vector.load %arg17[%c1, %c0_15, %c0_16] : memref<3x32x32xf32, #tpu.memory_space<vmem>>, vector<1x32x32xf32>
      %39 = vector.shape_cast %38 : vector<1x32x32xf32> to vector<32x32xf32>
      %40 = vector.shape_cast %29 : vector<32x32xf32> to vector<1x32x32xf32>
      tpu.vector_store %arg17[%c1, %c0_15, %c0_16], %40 {strides = array<i32>} : memref<3x32x32xf32, #tpu.memory_space<vmem>>, vector<1x32x32xf32>,
      %cst_17 = arith.constant dense<0.000000e+00> : vector<32x32xf32>
      %41 = tpu.matmul %29, %29, %cst_17 {dimension_numbers = #tpu.dot_dimension_numbers<[1], [0], [0], [1], [0, 0, 1, 1], [], []>} : vector<32x32xf32>, vector<32x32xf32>, vector<32x32xf32> -> vector<32x32xf32>
      %cst_18 = arith.constant 2.000000e+00 : f32
      %42 = vector.broadcast %cst_18 : f32 to vector<32x32xf32>
      %43 = arith.mulf %42, %41 : vector<32x32xf32>
      %44 = arith.subf %43, %34 : vector<32x32xf32>
      %c2 = arith.constant 2 : index
      %c0_19 = arith.constant 0 : index
      %c0_20 = arith.constant 0 : index
      %45 = vector.load %arg17[%c2, %c0_19, %c0_20] : memref<3x32x32xf32, #tpu.memory_space<vmem>>, vector<1x32x32xf32>
      %46 = vector.shape_cast %45 : vector<1x32x32xf32> to vector<32x32xf32>
      %47 = vector.shape_cast %44 : vector<32x32xf32> to vector<1x32x32xf32>
      tpu.vector_store %arg17[%c2, %c0_19, %c0_20], %47 {strides = array<i32>} : memref<3x32x32xf32, #tpu.memory_space<vmem>>, vector<1x32x32xf32>,
      %cst_21 = arith.constant 0.000000e+00 : f32
      %48 = vector.broadcast %cst_21 : f32 to vector<1x32x32xf32>
      %c0_22 = arith.constant 0 : index
      %c0_23 = arith.constant 0 : index
      %c0_24 = arith.constant 0 : index
      %49 = vector.load %arg18[%c0_22, %c0_23, %c0_24] : memref<1x32x32xf32, #tpu.memory_space<vmem>>, vector<1x32x32xf32>
      tpu.vector_store %arg18[%c0_22, %c0_23, %c0_24], %48 {strides = array<i32>} : memref<1x32x32xf32, #tpu.memory_space<vmem>>, vector<1x32x32xf32>,
    } else {
    }
    %c8_i32 = arith.constant 8 : i32
    %3 = arith.cmpi slt, %arg0, %c8_i32 : i32
    %4 = arith.extui %3 : i1 to i32
    %c0_i32_1 = arith.constant 0 : i32
    %5 = arith.cmpi ne, %4, %c0_i32_1 : i32
    scf.if %5 {
      %12 = arith.index_cast %arg0 : i32 to index
      %c0 = arith.constant 0 : index
      %c0_6 = arith.constant 0 : index
      %13 = vector.load %arg1[%12, %c0, %c0_6] : memref<8x32x2xf32, #tpu.memory_space<vmem>>, vector<1x32x2xf32>
      %14 = vector.shape_cast %13 : vector<1x32x2xf32> to vector<32x2xf32>
      %c0_7 = arith.constant 0 : index
      %c0_8 = arith.constant 0 : index
      %15 = vector.load %arg6[%c0_7, %c0_8] : memref<102x64xf32, #tpu.memory_space<vmem>>, vector<102x64xf32>
      %c0_9 = arith.constant 0 : index
      %c0_10 = arith.constant 0 : index
      %16 = vector.load %arg7[%c0_9, %c0_10] : memref<1x64xf32, #tpu.memory_space<vmem>>, vector<1x64xf32>
      %c0_11 = arith.constant 0 : index
      %c0_12 = arith.constant 0 : index
      %17 = vector.load %arg8[%c0_11, %c0_12] : memref<102x32xf32, #tpu.memory_space<vmem>>, vector<102x32xf32>
      %c0_13 = arith.constant 0 : index
      %c0_14 = arith.constant 0 : index
      %18 = vector.load %arg9[%c0_13, %c0_14] : memref<1x32xf32, #tpu.memory_space<vmem>>, vector<1x32xf32>
      %c0_15 = arith.constant 0 : index
      %c0_16 = arith.constant 0 : index
      %c0_17 = arith.constant 0 : index
      %19 = vector.load %arg18[%c0_15, %c0_16, %c0_17] : memref<1x32x32xf32, #tpu.memory_space<vmem>>, vector<1x32x32xf32>
      %20 = vector.shape_cast %19 : vector<1x32x32xf32> to vector<32x32xf32>
      %21 = tpu.concatenate %14, %20 in 1 : vector<32x2xf32>, vector<32x32xf32> -> vector<32x34xf32>
      %c0_18 = arith.constant 0 : index
      %c0_19 = arith.constant 0 : index
      %c0_20 = arith.constant 0 : index
      %22 = vector.load %arg17[%c0_18, %c0_19, %c0_20] : memref<3x32x32xf32, #tpu.memory_space<vmem>>, vector<1x32x32xf32>
      %23 = vector.shape_cast %22 : vector<1x32x32xf32> to vector<32x32xf32>
      %cst = arith.constant dense<0.000000e+00> : vector<32x34xf32>
      %24 = tpu.matmul %23, %21, %cst {dimension_numbers = #tpu.dot_dimension_numbers<[1], [0], [0], [1], [0, 0, 1, 1], [], []>} : vector<32x32xf32>, vector<32x34xf32>, vector<32x34xf32> -> vector<32x34xf32>
      %c1 = arith.constant 1 : index
      %c0_21 = arith.constant 0 : index
      %c0_22 = arith.constant 0 : index
      %25 = vector.load %arg17[%c1, %c0_21, %c0_22] : memref<3x32x32xf32, #tpu.memory_space<vmem>>, vector<1x32x32xf32>
      %26 = vector.shape_cast %25 : vector<1x32x32xf32> to vector<32x32xf32>
      %cst_23 = arith.constant dense<0.000000e+00> : vector<32x34xf32>
      %27 = tpu.matmul %26, %21, %cst_23 {dimension_numbers = #tpu.dot_dimension_numbers<[1], [0], [0], [1], [0, 0, 1, 1], [], []>} : vector<32x32xf32>, vector<32x34xf32>, vector<32x34xf32> -> vector<32x34xf32>
      %c2 = arith.constant 2 : index
      %c0_24 = arith.constant 0 : index
      %c0_25 = arith.constant 0 : index
      %28 = vector.load %arg17[%c2, %c0_24, %c0_25] : memref<3x32x32xf32, #tpu.memory_space<vmem>>, vector<1x32x32xf32>
      %29 = vector.shape_cast %28 : vector<1x32x32xf32> to vector<32x32xf32>
      %cst_26 = arith.constant dense<0.000000e+00> : vector<32x34xf32>
      %30 = tpu.matmul %29, %21, %cst_26 {dimension_numbers = #tpu.dot_dimension_numbers<[1], [0], [0], [1], [0, 0, 1, 1], [], []>} : vector<32x32xf32>, vector<32x34xf32>, vector<32x34xf32> -> vector<32x34xf32>
      %31 = tpu.concatenate %24, %27, %30 in 1 : vector<32x34xf32>, vector<32x34xf32>, vector<32x34xf32> -> vector<32x102xf32>
      %cst_27 = arith.constant dense<0.000000e+00> : vector<32x64xf32>
      %32 = tpu.matmul %31, %15, %cst_27 {dimension_numbers = #tpu.dot_dimension_numbers<[1], [0], [0], [1], [0, 0, 1, 1], [], []>} : vector<32x102xf32>, vector<102x64xf32>, vector<32x64xf32> -> vector<32x64xf32>
      %33 = vector.broadcast %16 : vector<1x64xf32> to vector<32x64xf32>
      %34 = arith.addf %32, %33 : vector<32x64xf32>
      %35 = arith.negf %34 : vector<32x64xf32>
      %36 = math.exp %35 : vector<32x64xf32>
      %cst_28 = arith.constant 1.000000e+00 : f32
      %37 = vector.broadcast %cst_28 : f32 to vector<32x64xf32>
      %38 = arith.addf %37, %36 : vector<32x64xf32>
      %39 = arith.divf %37, %38 : vector<32x64xf32>
      %40 = vector.extract_strided_slice %39 {offsets = [0, 0], sizes = [32, 32], strides = [1, 1]} : vector<32x64xf32> to vector<32x32xf32>
      %41 = vector.extract_strided_slice %39 {offsets = [0, 32], sizes = [32, 32], strides = [1, 1]} : vector<32x64xf32> to vector<32x32xf32>
      %42 = arith.mulf %40, %20 : vector<32x32xf32>
      %43 = tpu.concatenate %14, %42 in 1 : vector<32x2xf32>, vector<32x32xf32> -> vector<32x34xf32>
      %c0_29 = arith.constant 0 : index
      %c0_30 = arith.constant 0 : index
      %c0_31 = arith.constant 0 : index
      %44 = vector.load %arg17[%c0_29, %c0_30, %c0_31] : memref<3x32x32xf32, #tpu.memory_space<vmem>>, vector<1x32x32xf32>
      %45 = vector.shape_cast %44 : vector<1x32x32xf32> to vector<32x32xf32>
      %cst_32 = arith.constant dense<0.000000e+00> : vector<32x34xf32>
      %46 = tpu.matmul %45, %43, %cst_32 {dimension_numbers = #tpu.dot_dimension_numbers<[1], [0], [0], [1], [0, 0, 1, 1], [], []>} : vector<32x32xf32>, vector<32x34xf32>, vector<32x34xf32> -> vector<32x34xf32>
      %c1_33 = arith.constant 1 : index
      %c0_34 = arith.constant 0 : index
      %c0_35 = arith.constant 0 : index
      %47 = vector.load %arg17[%c1_33, %c0_34, %c0_35] : memref<3x32x32xf32, #tpu.memory_space<vmem>>, vector<1x32x32xf32>
      %48 = vector.shape_cast %47 : vector<1x32x32xf32> to vector<32x32xf32>
      %cst_36 = arith.constant dense<0.000000e+00> : vector<32x34xf32>
      %49 = tpu.matmul %48, %43, %cst_36 {dimension_numbers = #tpu.dot_dimension_numbers<[1], [0], [0], [1], [0, 0, 1, 1], [], []>} : vector<32x32xf32>, vector<32x34xf32>, vector<32x34xf32> -> vector<32x34xf32>
      %c2_37 = arith.constant 2 : index
      %c0_38 = arith.constant 0 : index
      %c0_39 = arith.constant 0 : index
      %50 = vector.load %arg17[%c2_37, %c0_38, %c0_39] : memref<3x32x32xf32, #tpu.memory_space<vmem>>, vector<1x32x32xf32>
      %51 = vector.shape_cast %50 : vector<1x32x32xf32> to vector<32x32xf32>
      %cst_40 = arith.constant dense<0.000000e+00> : vector<32x34xf32>
      %52 = tpu.matmul %51, %43, %cst_40 {dimension_numbers = #tpu.dot_dimension_numbers<[1], [0], [0], [1], [0, 0, 1, 1], [], []>} : vector<32x32xf32>, vector<32x34xf32>, vector<32x34xf32> -> vector<32x34xf32>
      %53 = tpu.concatenate %46, %49, %52 in 1 : vector<32x34xf32>, vector<32x34xf32>, vector<32x34xf32> -> vector<32x102xf32>
      %cst_41 = arith.constant dense<0.000000e+00> : vector<32x32xf32>
      %54 = tpu.matmul %53, %17, %cst_41 {dimension_numbers = #tpu.dot_dimension_numbers<[1], [0], [0], [1], [0, 0, 1, 1], [], []>} : vector<32x102xf32>, vector<102x32xf32>, vector<32x32xf32> -> vector<32x32xf32>
      %55 = vector.broadcast %18 : vector<1x32xf32> to vector<32x32xf32>
      %56 = arith.addf %54, %55 : vector<32x32xf32>
      %57 = math.tanh %56 : vector<32x32xf32>
      %58 = arith.mulf %41, %20 : vector<32x32xf32>
      %cst_42 = arith.constant 1.000000e+00 : f32
      %59 = vector.broadcast %cst_42 : f32 to vector<32x32xf32>
      %60 = arith.subf %59, %41 : vector<32x32xf32>
      %61 = arith.mulf %60, %57 : vector<32x32xf32>
      %62 = arith.addf %58, %61 : vector<32x32xf32>
      %c0_43 = arith.constant 0 : index
      %c0_44 = arith.constant 0 : index
      %c0_45 = arith.constant 0 : index
      %63 = vector.load %arg18[%c0_43, %c0_44, %c0_45] : memref<1x32x32xf32, #tpu.memory_space<vmem>>, vector<1x32x32xf32>
      %64 = vector.shape_cast %63 : vector<1x32x32xf32> to vector<32x32xf32>
      %65 = vector.shape_cast %62 : vector<32x32xf32> to vector<1x32x32xf32>
      tpu.vector_store %arg18[%c0_43, %c0_44, %c0_45], %65 {strides = array<i32>} : memref<1x32x32xf32, #tpu.memory_space<vmem>>, vector<1x32x32xf32>,
    } else {
    }
    %c8_i32_2 = arith.constant 8 : i32
    %6 = arith.cmpi eq, %arg0, %c8_i32_2 : i32
    %7 = arith.extui %6 : i1 to i32
    %c0_i32_3 = arith.constant 0 : i32
    %8 = arith.cmpi ne, %7, %c0_i32_3 : i32
    scf.if %8 {
      %c0 = arith.constant 0 : index
      %c0_6 = arith.constant 0 : index
      %c0_7 = arith.constant 0 : index
      %12 = vector.load %arg18[%c0, %c0_6, %c0_7] : memref<1x32x32xf32, #tpu.memory_space<vmem>>, vector<1x32x32xf32>
      %13 = vector.shape_cast %12 : vector<1x32x32xf32> to vector<32x32xf32>
      %c0_8 = arith.constant 0 : index
      %c0_9 = arith.constant 0 : index
      %14 = vector.load %arg4[%c0_8, %c0_9] : memref<32x8xf32, #tpu.memory_space<vmem>>, vector<32x8xf32>
      %cst = arith.constant dense<0.000000e+00> : vector<32x8xf32>
      %15 = tpu.matmul %13, %14, %cst {dimension_numbers = #tpu.dot_dimension_numbers<[1], [0], [0], [1], [0, 0, 1, 1], [], []>} : vector<32x32xf32>, vector<32x8xf32>, vector<32x8xf32> -> vector<32x8xf32>
      %c0_10 = arith.constant 0 : index
      %c0_11 = arith.constant 0 : index
      %16 = vector.load %arg5[%c0_10, %c0_11] : memref<1x8xf32, #tpu.memory_space<vmem>>, vector<1x8xf32>
      %17 = vector.broadcast %16 : vector<1x8xf32> to vector<32x8xf32>
      %18 = arith.addf %15, %17 : vector<32x8xf32>
      %19 = vector.extract_strided_slice %18 {offsets = [0, 0], sizes = [16, 8], strides = [1, 1]} : vector<32x8xf32> to vector<16x8xf32>
      %cst_12 = arith.constant dense<0.000000e+00> : vector<16x16xf32>
      %20 = tpu.matmul %19, %19, %cst_12 {dimension_numbers = #tpu.dot_dimension_numbers<[1], [1], [0], [0], [0, 0, 1, 0], [], []>} : vector<16x8xf32>, vector<16x8xf32>, vector<16x16xf32> -> vector<16x16xf32>
      %cst_13 = arith.constant 0.000000e+00 : f32
      %21 = vector.broadcast %cst_13 : f32 to vector<16x16xf32>
      %22 = arith.maximumf %20, %21 : vector<16x16xf32>
      %cst_14 = arith.constant dense<0xFF800000> : vector<16xf32>
      %23 = vector.multi_reduction <maximumf>, %22, %cst_14 [1] : vector<16x16xf32> to vector<16xf32>
      %24 = vector.shape_cast %23 : vector<16xf32> to vector<16x1xf32>
      %25 = vector.broadcast %24 : vector<16x1xf32> to vector<16x16xf32>
      %26 = arith.subf %22, %25 : vector<16x16xf32>
      %27 = math.exp %26 : vector<16x16xf32>
      %cst_15 = arith.constant dense<0.000000e+00> : vector<16xf32>
      %28 = vector.multi_reduction <add>, %27, %cst_15 [1] : vector<16x16xf32> to vector<16xf32>
      %29 = vector.shape_cast %28 : vector<16xf32> to vector<16x1xf32>
      %30 = vector.broadcast %29 : vector<16x1xf32> to vector<16x16xf32>
      %31 = arith.divf %27, %30 : vector<16x16xf32>
      %32 = vector.extract_strided_slice %18 {offsets = [16, 0], sizes = [16, 8], strides = [1, 1]} : vector<32x8xf32> to vector<16x8xf32>
      %cst_16 = arith.constant dense<0.000000e+00> : vector<16x16xf32>
      %33 = tpu.matmul %32, %32, %cst_16 {dimension_numbers = #tpu.dot_dimension_numbers<[1], [1], [0], [0], [0, 0, 1, 0], [], []>} : vector<16x8xf32>, vector<16x8xf32>, vector<16x16xf32> -> vector<16x16xf32>
      %cst_17 = arith.constant 0.000000e+00 : f32
      %34 = vector.broadcast %cst_17 : f32 to vector<16x16xf32>
      %35 = arith.maximumf %33, %34 : vector<16x16xf32>
      %cst_18 = arith.constant dense<0xFF800000> : vector<16xf32>
      %36 = vector.multi_reduction <maximumf>, %35, %cst_18 [1] : vector<16x16xf32> to vector<16xf32>
      %37 = vector.shape_cast %36 : vector<16xf32> to vector<16x1xf32>
      %38 = vector.broadcast %37 : vector<16x1xf32> to vector<16x16xf32>
      %39 = arith.subf %35, %38 : vector<16x16xf32>
      %40 = math.exp %39 : vector<16x16xf32>
      %cst_19 = arith.constant dense<0.000000e+00> : vector<16xf32>
      %41 = vector.multi_reduction <add>, %40, %cst_19 [1] : vector<16x16xf32> to vector<16xf32>
      %42 = vector.shape_cast %41 : vector<16xf32> to vector<16x1xf32>
      %43 = vector.broadcast %42 : vector<16x1xf32> to vector<16x16xf32>
      %44 = arith.divf %40, %43 : vector<16x16xf32>
      %cst_20 = arith.constant 0.000000e+00 : f32
      %45 = vector.broadcast %cst_20 : f32 to vector<16x16xf32>
      %46 = tpu.concatenate %31, %45 in 1 : vector<16x16xf32>, vector<16x16xf32> -> vector<16x32xf32>
      %cst_21 = arith.constant 0.000000e+00 : f32
      %47 = vector.broadcast %cst_21 : f32 to vector<16x16xf32>
      %48 = tpu.concatenate %47, %44 in 1 : vector<16x16xf32>, vector<16x16xf32> -> vector<16x32xf32>
      %49 = tpu.concatenate %46, %48 in 0 : vector<16x32xf32>, vector<16x32xf32> -> vector<32x32xf32>
      %50 = tpu.iota {dimensions = array<i32: 0>} : vector<32x32xi32>
      %51 = tpu.iota {dimensions = array<i32: 1>} : vector<32x32xi32>
      %52 = arith.cmpi eq, %50, %51 : vector<32x32xi32>
      %53 = arith.extui %52 : vector<32x32xi1> to vector<32x32xi32>
      %54 = arith.sitofp %53 : vector<32x32xi32> to vector<32x32xf32>
      %c0_22 = arith.constant 0 : index
      %c0_23 = arith.constant 0 : index
      %c0_24 = arith.constant 0 : index
      %55 = vector.load %arg17[%c0_22, %c0_23, %c0_24] : memref<3x32x32xf32, #tpu.memory_space<vmem>>, vector<1x32x32xf32>
      %56 = vector.shape_cast %55 : vector<1x32x32xf32> to vector<32x32xf32>
      %57 = vector.shape_cast %54 : vector<32x32xf32> to vector<1x32x32xf32>
      tpu.vector_store %arg17[%c0_22, %c0_23, %c0_24], %57 {strides = array<i32>} : memref<3x32x32xf32, #tpu.memory_space<vmem>>, vector<1x32x32xf32>,
      %c1 = arith.constant 1 : index
      %c0_25 = arith.constant 0 : index
      %c0_26 = arith.constant 0 : index
      %58 = vector.load %arg17[%c1, %c0_25, %c0_26] : memref<3x32x32xf32, #tpu.memory_space<vmem>>, vector<1x32x32xf32>
      %59 = vector.shape_cast %58 : vector<1x32x32xf32> to vector<32x32xf32>
      %60 = vector.shape_cast %49 : vector<32x32xf32> to vector<1x32x32xf32>
      tpu.vector_store %arg17[%c1, %c0_25, %c0_26], %60 {strides = array<i32>} : memref<3x32x32xf32, #tpu.memory_space<vmem>>, vector<1x32x32xf32>,
      %cst_27 = arith.constant dense<0.000000e+00> : vector<32x32xf32>
      %61 = tpu.matmul %49, %49, %cst_27 {dimension_numbers = #tpu.dot_dimension_numbers<[1], [0], [0], [1], [0, 0, 1, 1], [], []>} : vector<32x32xf32>, vector<32x32xf32>, vector<32x32xf32> -> vector<32x32xf32>
      %cst_28 = arith.constant 2.000000e+00 : f32
      %62 = vector.broadcast %cst_28 : f32 to vector<32x32xf32>
      %63 = arith.mulf %62, %61 : vector<32x32xf32>
      %64 = arith.subf %63, %54 : vector<32x32xf32>
      %c2 = arith.constant 2 : index
      %c0_29 = arith.constant 0 : index
      %c0_30 = arith.constant 0 : index
      %65 = vector.load %arg17[%c2, %c0_29, %c0_30] : memref<3x32x32xf32, #tpu.memory_space<vmem>>, vector<1x32x32xf32>
      %66 = vector.shape_cast %65 : vector<1x32x32xf32> to vector<32x32xf32>
      %67 = vector.shape_cast %64 : vector<32x32xf32> to vector<1x32x32xf32>
      tpu.vector_store %arg17[%c2, %c0_29, %c0_30], %67 {strides = array<i32>} : memref<3x32x32xf32, #tpu.memory_space<vmem>>, vector<1x32x32xf32>,
      %cst_31 = arith.constant 0.000000e+00 : f32
      %68 = vector.broadcast %cst_31 : f32 to vector<32x1xf32>
      %c0_32 = arith.constant 0 : index
      %c0_33 = arith.constant 0 : index
      %69 = vector.load %arg19[%c0_32, %c0_33] : memref<32x1xf32, #tpu.memory_space<vmem>>, vector<32x1xf32>
      tpu.vector_store %arg19[%c0_32, %c0_33], %68 {strides = array<i32>} : memref<32x1xf32, #tpu.memory_space<vmem>>, vector<32x1xf32>,
    } else {
    }
    %c8_i32_4 = arith.constant 8 : i32
    %9 = arith.cmpi sge, %arg0, %c8_i32_4 : i32
    %10 = arith.extui %9 : i1 to i32
    %c0_i32_5 = arith.constant 0 : i32
    %11 = arith.cmpi ne, %10, %c0_i32_5 : i32
    scf.if %11 {
      %c8_i32_6 = arith.constant 8 : i32
      %12 = arith.subi %arg0, %c8_i32_6 : i32
      %c0 = arith.constant 0 : index
      %c0_7 = arith.constant 0 : index
      %13 = vector.load %arg19[%c0, %c0_7] : memref<32x1xf32, #tpu.memory_space<vmem>>, vector<32x1xf32>
      %14 = arith.index_cast %12 : i32 to index
      %c0_8 = arith.constant 0 : index
      %c0_9 = arith.constant 0 : index
      %15 = vector.load %arg2[%14, %c0_8, %c0_9] : memref<3x32x1xf32, #tpu.memory_space<vmem>>, vector<1x32x1xf32>
      %16 = vector.shape_cast %15 : vector<1x32x1xf32> to vector<32x1xf32>
      %17 = tpu.concatenate %13, %16 in 1 : vector<32x1xf32>, vector<32x1xf32> -> vector<32x2xf32>
      %c0_10 = arith.constant 0 : index
      %c0_11 = arith.constant 0 : index
      %18 = vector.load %arg10[%c0_10, %c0_11] : memref<102x64xf32, #tpu.memory_space<vmem>>, vector<102x64xf32>
      %c0_12 = arith.constant 0 : index
      %c0_13 = arith.constant 0 : index
      %19 = vector.load %arg11[%c0_12, %c0_13] : memref<1x64xf32, #tpu.memory_space<vmem>>, vector<1x64xf32>
      %c0_14 = arith.constant 0 : index
      %c0_15 = arith.constant 0 : index
      %20 = vector.load %arg12[%c0_14, %c0_15] : memref<102x32xf32, #tpu.memory_space<vmem>>, vector<102x32xf32>
      %c0_16 = arith.constant 0 : index
      %c0_17 = arith.constant 0 : index
      %21 = vector.load %arg13[%c0_16, %c0_17] : memref<1x32xf32, #tpu.memory_space<vmem>>, vector<1x32xf32>
      %c0_18 = arith.constant 0 : index
      %c0_19 = arith.constant 0 : index
      %c0_20 = arith.constant 0 : index
      %22 = vector.load %arg18[%c0_18, %c0_19, %c0_20] : memref<1x32x32xf32, #tpu.memory_space<vmem>>, vector<1x32x32xf32>
      %23 = vector.shape_cast %22 : vector<1x32x32xf32> to vector<32x32xf32>
      %24 = tpu.concatenate %17, %23 in 1 : vector<32x2xf32>, vector<32x32xf32> -> vector<32x34xf32>
      %c0_21 = arith.constant 0 : index
      %c0_22 = arith.constant 0 : index
      %c0_23 = arith.constant 0 : index
      %25 = vector.load %arg17[%c0_21, %c0_22, %c0_23] : memref<3x32x32xf32, #tpu.memory_space<vmem>>, vector<1x32x32xf32>
      %26 = vector.shape_cast %25 : vector<1x32x32xf32> to vector<32x32xf32>
      %cst = arith.constant dense<0.000000e+00> : vector<32x34xf32>
      %27 = tpu.matmul %26, %24, %cst {dimension_numbers = #tpu.dot_dimension_numbers<[1], [0], [0], [1], [0, 0, 1, 1], [], []>} : vector<32x32xf32>, vector<32x34xf32>, vector<32x34xf32> -> vector<32x34xf32>
      %c1 = arith.constant 1 : index
      %c0_24 = arith.constant 0 : index
      %c0_25 = arith.constant 0 : index
      %28 = vector.load %arg17[%c1, %c0_24, %c0_25] : memref<3x32x32xf32, #tpu.memory_space<vmem>>, vector<1x32x32xf32>
      %29 = vector.shape_cast %28 : vector<1x32x32xf32> to vector<32x32xf32>
      %cst_26 = arith.constant dense<0.000000e+00> : vector<32x34xf32>
      %30 = tpu.matmul %29, %24, %cst_26 {dimension_numbers = #tpu.dot_dimension_numbers<[1], [0], [0], [1], [0, 0, 1, 1], [], []>} : vector<32x32xf32>, vector<32x34xf32>, vector<32x34xf32> -> vector<32x34xf32>
      %c2 = arith.constant 2 : index
      %c0_27 = arith.constant 0 : index
      %c0_28 = arith.constant 0 : index
      %31 = vector.load %arg17[%c2, %c0_27, %c0_28] : memref<3x32x32xf32, #tpu.memory_space<vmem>>, vector<1x32x32xf32>
      %32 = vector.shape_cast %31 : vector<1x32x32xf32> to vector<32x32xf32>
      %cst_29 = arith.constant dense<0.000000e+00> : vector<32x34xf32>
      %33 = tpu.matmul %32, %24, %cst_29 {dimension_numbers = #tpu.dot_dimension_numbers<[1], [0], [0], [1], [0, 0, 1, 1], [], []>} : vector<32x32xf32>, vector<32x34xf32>, vector<32x34xf32> -> vector<32x34xf32>
      %34 = tpu.concatenate %27, %30, %33 in 1 : vector<32x34xf32>, vector<32x34xf32>, vector<32x34xf32> -> vector<32x102xf32>
      %cst_30 = arith.constant dense<0.000000e+00> : vector<32x64xf32>
      %35 = tpu.matmul %34, %18, %cst_30 {dimension_numbers = #tpu.dot_dimension_numbers<[1], [0], [0], [1], [0, 0, 1, 1], [], []>} : vector<32x102xf32>, vector<102x64xf32>, vector<32x64xf32> -> vector<32x64xf32>
      %36 = vector.broadcast %19 : vector<1x64xf32> to vector<32x64xf32>
      %37 = arith.addf %35, %36 : vector<32x64xf32>
      %38 = arith.negf %37 : vector<32x64xf32>
      %39 = math.exp %38 : vector<32x64xf32>
      %cst_31 = arith.constant 1.000000e+00 : f32
      %40 = vector.broadcast %cst_31 : f32 to vector<32x64xf32>
      %41 = arith.addf %40, %39 : vector<32x64xf32>
      %42 = arith.divf %40, %41 : vector<32x64xf32>
      %43 = vector.extract_strided_slice %42 {offsets = [0, 0], sizes = [32, 32], strides = [1, 1]} : vector<32x64xf32> to vector<32x32xf32>
      %44 = vector.extract_strided_slice %42 {offsets = [0, 32], sizes = [32, 32], strides = [1, 1]} : vector<32x64xf32> to vector<32x32xf32>
      %45 = arith.mulf %43, %23 : vector<32x32xf32>
      %46 = tpu.concatenate %17, %45 in 1 : vector<32x2xf32>, vector<32x32xf32> -> vector<32x34xf32>
      %c0_32 = arith.constant 0 : index
      %c0_33 = arith.constant 0 : index
      %c0_34 = arith.constant 0 : index
      %47 = vector.load %arg17[%c0_32, %c0_33, %c0_34] : memref<3x32x32xf32, #tpu.memory_space<vmem>>, vector<1x32x32xf32>
      %48 = vector.shape_cast %47 : vector<1x32x32xf32> to vector<32x32xf32>
      %cst_35 = arith.constant dense<0.000000e+00> : vector<32x34xf32>
      %49 = tpu.matmul %48, %46, %cst_35 {dimension_numbers = #tpu.dot_dimension_numbers<[1], [0], [0], [1], [0, 0, 1, 1], [], []>} : vector<32x32xf32>, vector<32x34xf32>, vector<32x34xf32> -> vector<32x34xf32>
      %c1_36 = arith.constant 1 : index
      %c0_37 = arith.constant 0 : index
      %c0_38 = arith.constant 0 : index
      %50 = vector.load %arg17[%c1_36, %c0_37, %c0_38] : memref<3x32x32xf32, #tpu.memory_space<vmem>>, vector<1x32x32xf32>
      %51 = vector.shape_cast %50 : vector<1x32x32xf32> to vector<32x32xf32>
      %cst_39 = arith.constant dense<0.000000e+00> : vector<32x34xf32>
      %52 = tpu.matmul %51, %46, %cst_39 {dimension_numbers = #tpu.dot_dimension_numbers<[1], [0], [0], [1], [0, 0, 1, 1], [], []>} : vector<32x32xf32>, vector<32x34xf32>, vector<32x34xf32> -> vector<32x34xf32>
      %c2_40 = arith.constant 2 : index
      %c0_41 = arith.constant 0 : index
      %c0_42 = arith.constant 0 : index
      %53 = vector.load %arg17[%c2_40, %c0_41, %c0_42] : memref<3x32x32xf32, #tpu.memory_space<vmem>>, vector<1x32x32xf32>
      %54 = vector.shape_cast %53 : vector<1x32x32xf32> to vector<32x32xf32>
      %cst_43 = arith.constant dense<0.000000e+00> : vector<32x34xf32>
      %55 = tpu.matmul %54, %46, %cst_43 {dimension_numbers = #tpu.dot_dimension_numbers<[1], [0], [0], [1], [0, 0, 1, 1], [], []>} : vector<32x32xf32>, vector<32x34xf32>, vector<32x34xf32> -> vector<32x34xf32>
      %56 = tpu.concatenate %49, %52, %55 in 1 : vector<32x34xf32>, vector<32x34xf32>, vector<32x34xf32> -> vector<32x102xf32>
      %cst_44 = arith.constant dense<0.000000e+00> : vector<32x32xf32>
      %57 = tpu.matmul %56, %20, %cst_44 {dimension_numbers = #tpu.dot_dimension_numbers<[1], [0], [0], [1], [0, 0, 1, 1], [], []>} : vector<32x102xf32>, vector<102x32xf32>, vector<32x32xf32> -> vector<32x32xf32>
      %58 = vector.broadcast %21 : vector<1x32xf32> to vector<32x32xf32>
      %59 = arith.addf %57, %58 : vector<32x32xf32>
      %60 = math.tanh %59 : vector<32x32xf32>
      %61 = arith.mulf %44, %23 : vector<32x32xf32>
      %cst_45 = arith.constant 1.000000e+00 : f32
      %62 = vector.broadcast %cst_45 : f32 to vector<32x32xf32>
      %63 = arith.subf %62, %44 : vector<32x32xf32>
      %64 = arith.mulf %63, %60 : vector<32x32xf32>
      %65 = arith.addf %61, %64 : vector<32x32xf32>
      %c0_46 = arith.constant 0 : index
      %c0_47 = arith.constant 0 : index
      %c0_48 = arith.constant 0 : index
      %66 = vector.load %arg18[%c0_46, %c0_47, %c0_48] : memref<1x32x32xf32, #tpu.memory_space<vmem>>, vector<1x32x32xf32>
      %67 = vector.shape_cast %66 : vector<1x32x32xf32> to vector<32x32xf32>
      %68 = vector.shape_cast %65 : vector<32x32xf32> to vector<1x32x32xf32>
      tpu.vector_store %arg18[%c0_46, %c0_47, %c0_48], %68 {strides = array<i32>} : memref<1x32x32xf32, #tpu.memory_space<vmem>>, vector<1x32x32xf32>,
      %c0_49 = arith.constant 0 : index
      %c0_50 = arith.constant 0 : index
      %69 = vector.load %arg14[%c0_49, %c0_50] : memref<32x1xf32, #tpu.memory_space<vmem>>, vector<32x1xf32>
      %cst_51 = arith.constant dense<0.000000e+00> : vector<32x1xf32>
      %70 = tpu.matmul %65, %69, %cst_51 {dimension_numbers = #tpu.dot_dimension_numbers<[1], [0], [0], [1], [0, 0, 1, 1], [], []>} : vector<32x32xf32>, vector<32x1xf32>, vector<32x1xf32> -> vector<32x1xf32>
      %c0_52 = arith.constant 0 : index
      %c0_53 = arith.constant 0 : index
      %71 = vector.load %arg15[%c0_52, %c0_53] : memref<1x1xf32, #tpu.memory_space<vmem>>, vector<1x1xf32>
      %72 = vector.broadcast %71 : vector<1x1xf32> to vector<32x1xf32>
      %73 = arith.addf %70, %72 : vector<32x1xf32>
      %c0_54 = arith.constant 0 : index
      %c0_55 = arith.constant 0 : index
      %74 = vector.load %arg19[%c0_54, %c0_55] : memref<32x1xf32, #tpu.memory_space<vmem>>, vector<32x1xf32>
      tpu.vector_store %arg19[%c0_54, %c0_55], %73 {strides = array<i32>} : memref<32x1xf32, #tpu.memory_space<vmem>>, vector<32x1xf32>,
      %75 = arith.index_cast %12 : i32 to index
      %c0_56 = arith.constant 0 : index
      %c0_57 = arith.constant 0 : index
      %76 = vector.load %arg16[%75, %c0_56, %c0_57] : memref<3x32x1xf32, #tpu.memory_space<vmem>>, vector<1x32x1xf32>
      %77 = vector.shape_cast %76 : vector<1x32x1xf32> to vector<32x1xf32>
      %78 = vector.shape_cast %73 : vector<32x1xf32> to vector<1x32x1xf32>
      tpu.vector_store %arg16[%75, %c0_56, %c0_57], %78 {strides = array<i32>} : memref<3x32x1xf32, #tpu.memory_space<vmem>>, vector<1x32x1xf32>,
    } else {
    }
    return
  }
  func.func @transform_0(%arg0: i32) -> (i32, i32, i32) {
    %c0_i32 = arith.constant 0 : i32
    %c0_i32_0 = arith.constant 0 : i32
    %c0_i32_1 = arith.constant 0 : i32
    %c0_i32_2 = arith.constant 0 : i32
    return %c0_i32, %c0_i32_0, %c0_i32_1 : i32, i32, i32
  }
  func.func @transform_1(%arg0: i32) -> (i32, i32, i32) {
    %c0_i32 = arith.constant 0 : i32
    %c0_i32_0 = arith.constant 0 : i32
    %c0_i32_1 = arith.constant 0 : i32
    %c0_i32_2 = arith.constant 0 : i32
    return %c0_i32, %c0_i32_0, %c0_i32_1 : i32, i32, i32
  }
  func.func @transform_2(%arg0: i32) -> (i32, i32) {
    %c0_i32 = arith.constant 0 : i32
    %c0_i32_0 = arith.constant 0 : i32
    %c0_i32_1 = arith.constant 0 : i32
    return %c0_i32, %c0_i32_0 : i32, i32
  }
  func.func @transform_3(%arg0: i32) -> (i32, i32) {
    %c0_i32 = arith.constant 0 : i32
    %c0_i32_0 = arith.constant 0 : i32
    %c0_i32_1 = arith.constant 0 : i32
    return %c0_i32, %c0_i32_0 : i32, i32
  }
  func.func @transform_4(%arg0: i32) -> (i32, i32) {
    %c0_i32 = arith.constant 0 : i32
    %c0_i32_0 = arith.constant 0 : i32
    %c0_i32_1 = arith.constant 0 : i32
    return %c0_i32, %c0_i32_0 : i32, i32
  }
  func.func @transform_5(%arg0: i32) -> (i32, i32) {
    %c0_i32 = arith.constant 0 : i32
    %c0_i32_0 = arith.constant 0 : i32
    %c0_i32_1 = arith.constant 0 : i32
    return %c0_i32, %c0_i32_0 : i32, i32
  }
  func.func @transform_6(%arg0: i32) -> (i32, i32) {
    %c0_i32 = arith.constant 0 : i32
    %c0_i32_0 = arith.constant 0 : i32
    %c0_i32_1 = arith.constant 0 : i32
    return %c0_i32, %c0_i32_0 : i32, i32
  }
  func.func @transform_7(%arg0: i32) -> (i32, i32) {
    %c0_i32 = arith.constant 0 : i32
    %c0_i32_0 = arith.constant 0 : i32
    %c0_i32_1 = arith.constant 0 : i32
    return %c0_i32, %c0_i32_0 : i32, i32
  }
  func.func @transform_8(%arg0: i32) -> (i32, i32) {
    %c0_i32 = arith.constant 0 : i32
    %c0_i32_0 = arith.constant 0 : i32
    %c0_i32_1 = arith.constant 0 : i32
    return %c0_i32, %c0_i32_0 : i32, i32
  }
  func.func @transform_9(%arg0: i32) -> (i32, i32) {
    %c0_i32 = arith.constant 0 : i32
    %c0_i32_0 = arith.constant 0 : i32
    %c0_i32_1 = arith.constant 0 : i32
    return %c0_i32, %c0_i32_0 : i32, i32
  }
  func.func @transform_10(%arg0: i32) -> (i32, i32) {
    %c0_i32 = arith.constant 0 : i32
    %c0_i32_0 = arith.constant 0 : i32
    %c0_i32_1 = arith.constant 0 : i32
    return %c0_i32, %c0_i32_0 : i32, i32
  }
  func.func @transform_11(%arg0: i32) -> (i32, i32) {
    %c0_i32 = arith.constant 0 : i32
    %c0_i32_0 = arith.constant 0 : i32
    %c0_i32_1 = arith.constant 0 : i32
    return %c0_i32, %c0_i32_0 : i32, i32
  }
  func.func @transform_12(%arg0: i32) -> (i32, i32) {
    %c0_i32 = arith.constant 0 : i32
    %c0_i32_0 = arith.constant 0 : i32
    %c0_i32_1 = arith.constant 0 : i32
    return %c0_i32, %c0_i32_0 : i32, i32
  }
  func.func @transform_13(%arg0: i32) -> (i32, i32) {
    %c0_i32 = arith.constant 0 : i32
    %c0_i32_0 = arith.constant 0 : i32
    %c0_i32_1 = arith.constant 0 : i32
    return %c0_i32, %c0_i32_0 : i32, i32
  }
  func.func @transform_14(%arg0: i32) -> (i32, i32) {
    %c0_i32 = arith.constant 0 : i32
    %c0_i32_0 = arith.constant 0 : i32
    %c0_i32_1 = arith.constant 0 : i32
    return %c0_i32, %c0_i32_0 : i32, i32
  }
  func.func @transform_15(%arg0: i32) -> (i32, i32, i32) {
    %c0_i32 = arith.constant 0 : i32
    %c0_i32_0 = arith.constant 0 : i32
    %c0_i32_1 = arith.constant 0 : i32
    %c0_i32_2 = arith.constant 0 : i32
    return %c0_i32, %c0_i32_0, %c0_i32_1 : i32, i32, i32
  }
}

</mosaic_0001>

<bundles_post_ra>
// kernel: _lambda_.1
= control target key start
LH: loop header
LB: loop body
LE: loop exit
PB: predicated region body
PF: predicated region fallthrough
CT: control target
= control target key end

     0   :  { %s2759_s20 = smov 0   ;;  %s3494_s0 = inlined_call_operand.vmem [shape: f32[8,32,2], index: 0, kind: input, shape index: {}]   ;;  %s3495_s1 = inlined_call_operand.vmem [shape: f32[3,32,1], index: 1, kind: input, shape index: {}]   ;;  %s3496_s2 = inlined_call_operand.vmem [shape: f32[16,8], index: 2, kind: input, shape index: {}]   ;;  %s3497_s3 = inlined_call_operand.vmem [shape: f32[32,8], index: 3, kind: input, shape index: {}]   ;;  %s3498_s4 = inlined_call_operand.vmem [shape: f32[1,8], index: 4, kind: input, shape index: {}]   ;;  %s3499_s5 = inlined_call_operand.vmem [shape: f32[102,64], index: 5, kind: input, shape index: {}]   ;;  %s3500_s6 = inlined_call_operand.vmem [shape: f32[1,64], index: 6, kind: input, shape index: {}]   ;;  %s3501_s7 = inlined_call_operand.vmem [shape: f32[102,32], index: 7, kind: input, shape index: {}]   ;;  %s3502_s8 = inlined_call_operand.vmem [shape: f32[1,32], index: 8, kind: input, shape index: {}]   ;;  %s3503_s9 = inlined_call_operand.vmem [shape: f32[102,64], index: 9, kind: input, shape index: {}]   ;;  %s3504_s10 = inlined_call_operand.vmem [shape: f32[1,64], index: 10, kind: input, shape index: {}]   ;;  %s3505_s11 = inlined_call_operand.vmem [shape: f32[102,32], index: 11, kind: input, shape index: {}]   ;;  %s3506_s12 = inlined_call_operand.vmem [shape: f32[1,32], index: 12, kind: input, shape index: {}]   ;;  %s3507_s13 = inlined_call_operand.vmem [shape: f32[32,1], index: 13, kind: input, shape index: {}]   ;;  %s3508_s14 = inlined_call_operand.<no memory space> [shape: f32[1,1], index: 14, kind: input, shape index: {}]   ;;  %s3509_s15 = inlined_call_operand.vmem [shape: f32[3,32,1], index: 15, kind: output, shape index: {}]  }
   0x1   :  { %v20_v0 = vstv %s3508_s14 }
   0x2   :  { %21 = vst [vmem:[#allocation5] sm:$0x1] %v20_v0 }
   0x3 LB: > { %s2765_s21 = sadd.s32 4294967295, %s2659_s20   ;;  %p2337_p0 = scmp.ge.s32.totalorder %s2659_s20, 1  ;;  %s2659_s20 = sphi %s2759_s20, %s27_s20  }
   0x4   : > { %p424_p1 = scmp.lt.s32.totalorder %s2659_s20, 12 }
   0x6   : > { %p425_p2 = pnand %p2337_p0, %p424_p1 }
   0x7   : > { %p2338_p3 = scmp.ne.s32.totalorder (!%p425_p2), %s2765_s21, 0 }
   0x8   : > { %428 = sbr.rel (%p425_p2) target bundleno = 4373 (0x1115), region = 80 }
   0xd   : > { %465 = sbr.rel (%p2338_p3) target bundleno = 673 (0x2a1), region = 84  ;;  %s2661_s25 = smov (!%p2338_p3), 16  }
  0x12   : > { %v467_v1 = vld [vmem:[%s3496_s2 + $0x8] sm:$0xff]  ;;  %vm468_vm0 = vcmask 64512   ;;  %v466_v2 = vld [vmem:[%s3496_s2] sm:$0xff]  ;;  %vm500_vm1 = vcmask 130048   ;;  %vm580_vm6 = vcmask 261120   ;;  %v561_v45 = vlaneseq }
  0x13   : > { %2471 = vmatpush.xpose.msk.msra.mxu3 %vm468_vm0, %v467_v1  ;;  %2339 = vmatpush.xpose.msk.msra.mxu0 %vm468_vm0, %v467_v1  ;;  %v2662_v46 = vmov 0.0   ;;  %vm2347_vm12 = vmneg %vm500_vm1 }
  0x14   : > { %644 = vst.msk [vmem:[#allocation3] sm:$0xff] %vm580_vm6, %v2662_v46  ;;  %v562_v47 = vshrl.u32 %v561_v45, 7  ;;  %v567_v48 = vand.u32 127, %v561_v45 }
  0x15   : > { %645 = vst.msk [vmem:[#allocation3 + $0x8] sm:$0xff] %vm580_vm6, %v2662_v46 }
  0x16   : > { %646 = vst.msk [vmem:[#allocation3 + $0x10] sm:$0xff] %vm580_vm6, %v2662_v46  ;;  %vm568_vm11 = vcmp.eq.s32.totalorder %v562_v47, %v567_v48  ;;  %v564_v54 = vadd.s32 16, %v562_v47  ;;  %v563_v55 = vadd.s32 8, %v562_v47  ;;  %v565_v58 = vadd.s32 24, %v562_v47 }
  0x17   : > { %2472 = vmatpush.xpose.msk.msra.mxu3 %vm468_vm0, %v466_v2  ;;  %2340 = vmatpush.xpose.msk.msra.mxu0 %vm468_vm0, %v466_v2  ;;  %647 = vst.msk [vmem:[#allocation3 + $0x18] sm:$0xff] %vm580_vm6, %v2662_v46  ;;  %v2343_v49 = vsel %vm568_vm11, 1.0, %v2662_v46 }
  0x18   : > { %581 = vst.msk [vmem:[#allocation2] sm:$0xff] %vm580_vm6, %v2343_v49  ;;  %vm570_vm13 = vcmp.eq.s32.totalorder %v564_v54, %v567_v48  ;;  %vm569_vm14 = vcmp.eq.s32.totalorder %v563_v55, %v567_v48  ;;  %vm571_vm15 = vcmp.eq.s32.totalorder %v565_v58, %v567_v48 }
  0x19   : > { %v2345_v56 = vsel %vm570_vm13, 1.0, %v2662_v46  ;;  %v2344_v57 = vsel %vm569_vm14, 1.0, %v2662_v46  ;;  %v2346_v59 = vsel %vm571_vm15, 1.0, %v2662_v46 }
  0x1a   : > { %2342 = vmatmul.msk.f32.vlgmr.msra.gmra.mxu3 %vm468_vm0, %v467_v1  ;;  %2341 = vmatmul.msk.f32.vlgmr.msra.gmra.mxu0 %vm468_vm0, %v466_v2  ;;  %583 = vst.msk [vmem:[#allocation2 + $0x10] sm:$0xff] %vm580_vm6, %v2345_v56 }
  0x1b   : > { %582 = vst.msk [vmem:[#allocation2 + $0x8] sm:$0xff] %vm580_vm6, %v2344_v57 }
  0x1c   : > { %584 = vst.msk [vmem:[#allocation2 + $0x18] sm:$0xff] %vm580_vm6, %v2346_v59 }
  0x97   : > { %v492_v5 = vpop.f32.mrf.mxu0 }
  0x98   : > { %v498_v7 = vmax.f32 %v492_v5, 0.0 }
  0x9a   : > { %v501_v8 = vsel %vm500_vm1, %v498_v7, -inf }
  0x9d   : > { %v495_v3 = vpop.f32.mrf.mxu3 }
  0x9e   : > { %v499_v4 = vmax.f32 %v495_v3, 0.0 }
  0xa0   : > { %v504_v6 = vsel %vm500_vm1, %v499_v4, -inf }
  0xa1   : > { %505 = vmax.xlane.f32.xlu0 %v504_v6 }
  0xa9   : > { %502 = vmax.xlane.f32.xlu0 %v501_v8 }
 0x114   : > { %v506_v9 = vpop.xlane.xlu0 %505 }
 0x115   : > { %v508_v10 = vsub.f32 %v499_v4, %v506_v9 }
 0x117   : > { %v511_v11 = vmul.f32 1.442695, %v508_v10 }
 0x119   : > { %2525 = vpow2.f32 %v511_v11 }
 0x11c   : > { %v503_v12 = vpop.xlane.xlu0 %502 }
 0x11d   : > { %v507_v13 = vsub.f32 %v498_v7, %v503_v12 }
 0x11f   : > { %v2526_v14 = vpop.eup %2525  ;;  %v509_v15 = vmul.f32 1.442695, %v507_v13 }
 0x120   : > { %v516_v16 = vsel %vm500_vm1, %v2526_v14, 0.0 }
 0x121   : > { %2527 = vpow2.f32 %v509_v15  ;;  %517 = vadd.xlane.f32.xlu1 %v516_v16 }
 0x127   : > { %v2528_v17 = vpop.eup %2527 }
 0x128   : > { %v513_v18 = vsel %vm500_vm1, %v2528_v17, 0.0 }
 0x129   : > { %514 = vadd.xlane.f32.xlu1 %v513_v18 }
 0x194   : > { %v518_v19 = vpop.xlane.xlu1 %517 }
 0x195   : > { %2529 = vrcp.f32 %v518_v19  ;;  %v545_v24 = vand.u32 2147483648, %v518_v19  ;;  %v543_v26 = vand.u32 2147483647, %v518_v19  ;;  %vm539_vm3 = vweird.f32 %v518_v19 }
 0x197   : > { %v546_v29 = vor.u32 1.1754944e-38, %v545_v24  ;;  %vm544_vm5 = vcmp.eq.f32.partialorder %v543_v26, 8.507059e+37 }
 0x19b   : > { %v2530_v20 = vpop.eup %2529 }
 0x19c   : > { %v535_v21 = vmul.f32 %v2530_v20, %v518_v19  ;;  %v515_v22 = vpop.xlane.xlu1 %514  ;;  %vm540_vm2 = vweird.f32 %v2530_v20 }
 0x19d   : > { %2531 = vrcp.f32 %v515_v22  ;;  %vm541_vm4 = vmor %vm539_vm3, %vm540_vm2  ;;  %v530_v35 = vand.u32 2147483648, %v515_v22  ;;  %v528_v37 = vand.u32 2147483647, %v515_v22  ;;  %vm524_vm8 = vweird.f32 %v515_v22 }
 0x19e   : > { %v536_v23 = vsub.f32 1.0, %v535_v21 }
 0x19f   : > { %v531_v40 = vor.u32 1.1754944e-38, %v530_v35  ;;  %vm529_vm10 = vcmp.eq.f32.partialorder %v528_v37, 8.507059e+37 }
 0x1a0   : > { %v537_v25 = vmul.f32 %v2530_v20, %v536_v23 }
 0x1a2   : > { %v538_v27 = vadd.f32 %v2530_v20, %v537_v25 }
 0x1a3   : > { %v2532_v28 = vpop.eup %2531 }
 0x1a4   : > { %v520_v30 = vmul.f32 %v2532_v28, %v515_v22  ;;  %v542_v31 = vsel %vm541_vm4, %v2530_v20, %v538_v27  ;;  %vm525_vm7 = vweird.f32 %v2532_v28 }
 0x1a5   : > { %v547_v32 = vsel %vm544_vm5, %v546_v29, %v542_v31  ;;  %vm526_vm9 = vmor %vm524_vm8, %vm525_vm7 }
 0x1a6   : > { %v521_v33 = vsub.f32 1.0, %v520_v30  ;;  %v548_v34 = vmul.f32 %v2526_v14, %v547_v32 }
 0x1a8   : > { %v522_v36 = vmul.f32 %v2532_v28, %v521_v33  ;;  %555 = vrot.lane.b32.xlu2 %v548_v34, %s2661_s25  ;;  %v550_v38 = vsel %vm500_vm1, %v548_v34, 0.0 }
 0x1a9   : > { %587 = vst.msk [vmem:[#allocation2 + $0x28] sm:$0xff] %vm580_vm6, %v550_v38 }
 0x1aa   : > { %v523_v39 = vadd.f32 %v2532_v28, %v522_v36 }
 0x1ac   : > { %v527_v41 = vsel %vm526_vm9, %v2532_v28, %v523_v39 }
 0x1ad   : > { %v532_v42 = vsel %vm529_vm10, %v531_v40, %v527_v41 }
 0x1ae   : > { %v533_v43 = vmul.f32 %v2528_v17, %v532_v42 }
 0x1b0   : > { %553 = vrot.lane.b32.xlu2 %v533_v43, %s2661_s25  ;;  %v549_v44 = vsel %vm500_vm1, %v533_v43, 0.0 }
 0x1b1   : > { %586 = vst.msk [vmem:[#allocation2 + $0x20] sm:$0xff] %vm580_vm6, %v549_v44 }
 0x202   : > { %v556_v50 = vpop.permute.xlu2 %555 }
 0x203   : > { %2348 = vmatpush.msk.msra.mxu1 %vm2347_vm12, %v556_v50  ;;  %2473 = vmatpush.msk.msra.mxu2 %vm2347_vm12, %v556_v50  ;;  %v560_v51 = vsel %vm500_vm1, 0.0, %v556_v50 }
 0x204   : > { %589 = vst.msk [vmem:[#allocation2 + $0x38] sm:$0xff] %vm580_vm6, %v560_v51 }
 0x20a   : > { %v554_v52 = vpop.permute.xlu2 %553 }
 0x20b   : > { %2350 = vmatpush.msk.msra.mxu1 %vm2347_vm12, %v554_v52  ;;  %2474 = vmatpush.msk.msra.mxu2 %vm2347_vm12, %v554_v52  ;;  %v559_v53 = vsel %vm500_vm1, 0.0, %v554_v52 }
 0x20c   : > { %588 = vst.msk [vmem:[#allocation2 + $0x30] sm:$0xff] %vm580_vm6, %v559_v53 }
 0x20d   : > { %2351 = vmatpush.msk.msra.mxu1 %vm500_vm1, %v548_v34  ;;  %2475 = vmatpush.msk.msra.mxu2 %vm500_vm1, %v548_v34 }
 0x20f   : > { %2352 = vmatpush.msk.msra.mxu1 %vm500_vm1, %v533_v43  ;;  %2476 = vmatpush.msk.msra.mxu2 %vm500_vm1, %v533_v43 }
 0x210   : > { %2353 = vmatmul.msk.f32.vlgmr.msra.gmra.mxu1 %vm580_vm6, %v549_v44  ;;  %2355 = vmatmul.msk.f32.vlgmr.msra.gmra.mxu2 %vm580_vm6, %v559_v53 }
 0x218   : > { %2354 = vmatmul.msk.f32.gmra.mxu1 %vm580_vm6, %v550_v38  ;;  %2356 = vmatmul.msk.f32.gmra.mxu2 %vm580_vm6, %v560_v51 }
 0x28d   : > { %v619_v60 = vpop.f32.mrf.mxu1 }
 0x28e   : > { %v631_v61 = vmul.f32 2.0, %v619_v60 }
 0x290   : > { %v635_v62 = vsub.f32 %v631_v61, %v2343_v49 }
 0x292   : > { %640 = vst.msk [vmem:[#allocation2 + $0x40] sm:$0xff] %vm580_vm6, %v635_v62 }
 0x293   : > { %v625_v63 = vpop.f32.mrf.mxu2 }
 0x294   : > { %v633_v0 = vmul.f32 2.0, %v625_v63 }
 0x295   : > { %v622_v1 = vpop.f32.mrf.mxu1 }
 0x296   : > { %v637_v2 = vsub.f32 %v633_v0, %v2345_v56  ;;  %v632_v3 = vmul.f32 2.0, %v622_v1 }
 0x298   : > { %642 = vst.msk [vmem:[#allocation2 + $0x50] sm:$0xff] %vm580_vm6, %v637_v2  ;;  %v636_v4 = vsub.f32 %v632_v3, %v2344_v57 }
 0x29a   : > { %641 = vst.msk [vmem:[#allocation2 + $0x48] sm:$0xff] %vm580_vm6, %v636_v4 }
 0x29b   : > { %v628_v5 = vpop.f32.mrf.mxu2 }
 0x29c   : > { %v634_v6 = vmul.f32 2.0, %v628_v5 }
 0x29e   : > { %v638_v7 = vsub.f32 %v634_v6, %v2346_v59 }
 0x2a0   : > { %643 = vst.msk [vmem:[#allocation2 + $0x58] sm:$0xff] %vm580_vm6, %v638_v7 }
 0x2a1 PF: > { %p2357_p4 = scmp.ge.s32.totalorder %s2765_s21, 8 }
 0x2a2   : > { %s2663_s26 = smov (!%p2357_p4), 2   ;;  %s2358_s27 = sshll.u32 (!%p2357_p4), %s2765_s21, 5 }
 0x2a3   : > { %651 = sbr.rel (%p2357_p4) target bundleno = 2029 (0x7ed), region = 88  ;;  %s653_s30 = scalar_lea.vmem (!%p2357_p4), %s3494_s0, %s2358_s27 }
 0x2a4   : > { %s2664_s16 = smov (!%p2357_p4), 34   ;;  %s2665_s17 = smov (!%p2357_p4), 68  }
 0x2a5   : > { %s2666_s14 = smov (!%p2357_p4), 32   ;;  %s2667_s27 = smov (!%p2357_p4), 96  }
 0x2a8   : > { %v2810_v8 = vld [vmem:[#allocation3 + $0x10] sm:$0xff]  ;;  %v2812_v9 = vld [vmem:[#allocation3 + $0x18] sm:$0xff]  ;;  %v2817_v11 = vld [vmem:[#allocation3] sm:$0xff]  ;;  %vm706_vm0 = vcmask 15360   ;;  %vm715_vm1 = vcmask 261120   ;;  %vm907_vm2 = vcmask 1045504  }
 0x2a9   : > { %v2533_v10 = vpack.i.bf16 %v2810_v8, %v2812_v9  ;;  %v2819_v12 = vld [vmem:[#allocation3 + $0x8] sm:$0xff]  ;;  %v2828_v15 = vld [vmem:[%s653_s30 + $0x18] sm:$0xff]  ;;  %v2830_v18 = vld [vmem:[%s653_s30 + $0x10] sm:$0xff]  ;;  %vm881_vm3 = vcmask 277504   ;;  %vm894_vm4 = vcmask 834560   ;;  %vm886_vm5 = vcmask 556032  }
 0x2aa   : > { %v2538_v13 = vpack.i.bf16 %v2817_v11, %v2819_v12  ;;  %v2836_v22 = vld [vmem:[%s653_s30 + $0x8] sm:$0xff]  ;;  %v2838_v25 = vld [vmem:[%s653_s30] sm:$0xff]  ;;  %v2868_v34 = vld [vmem:[#allocation2 + $0x30] sm:$0xff] }
 0x2ab   : > { %2534 = vrot.lane.b32.xlu0 %v2533_v10, %s2663_s26  ;;  %v2842_v27 = vld [vmem:[#allocation2 + $0x20] sm:$0xff]  ;;  %v2856_v31 = vld [vmem:[#allocation2 + $0x28] sm:$0xff]  ;;  %v2870_v35 = vld [vmem:[#allocation2 + $0x50] sm:$0xff] }
 0x2ac   : > { %v2846_v29 = vld [vmem:[#allocation2 + $0x40] sm:$0xff]  ;;  %v2858_v32 = vld [vmem:[#allocation2 + $0x48] sm:$0xff]  ;;  %v2876_v36 = vld [vmem:[#allocation2 + $0x38] sm:$0xff] }
 0x2ad   : > { %v2848_v30 = vld [vmem:[#allocation2] sm:$0xff]  ;;  %v2860_v33 = vld [vmem:[#allocation2 + $0x8] sm:$0xff]  ;;  %v2878_v37 = vld [vmem:[#allocation2 + $0x58] sm:$0xff] }
 0x2ae   : > { %v2884_v38 = vld [vmem:[#allocation2 + $0x10] sm:$0xff]  ;;  %v2888_v39 = vld [vmem:[#allocation2 + $0x18] sm:$0xff]  ;;  %v670_v48 = vld [vmem:[%s3499_s5 + $0x60] sm:$0x3f] }
 0x2af   : > { %v669_v49 = vld [vmem:[%s3499_s5 + $0x58] sm:$0xff]  ;;  %2371 = vmatpush.msk.msra.mxu3 %vm907_vm2, %v670_v48  ;;  %v668_v50 = vld [vmem:[%s3499_s5 + $0x50] sm:$0xff]  ;;  %v667_v51 = vld [vmem:[%s3499_s5 + $0x48] sm:$0xff] }
 0x2b0   : > { %v666_v52 = vld [vmem:[%s3499_s5 + $0x40] sm:$0xff]  ;;  %v665_v53 = vld [vmem:[%s3499_s5 + $0x38] sm:$0xff]  ;;  %v664_v54 = vld [vmem:[%s3499_s5 + $0x30] sm:$0xff] }
 0x2b1   : > { %915 = vmatpush.msra.mxu3 %v669_v49  ;;  %v663_v55 = vld [vmem:[%s3499_s5 + $0x28] sm:$0xff]  ;;  %v662_v56 = vld [vmem:[%s3499_s5 + $0x20] sm:$0xff]  ;;  %v661_v57 = vld [vmem:[%s3499_s5 + $0x18] sm:$0xff] }
 0x2b2   : > { %v660_v58 = vld [vmem:[%s3499_s5 + $0x10] sm:$0xff]  ;;  %v659_v59 = vld [vmem:[%s3499_s5 + $0x8] sm:$0xff]  ;;  %v658_v60 = vld [vmem:[%s3499_s5] sm:$0xff] }
 0x2b3   : > { %2539 = vrot.lane.b32.xlu0 %v2538_v13, %s2663_s26  ;;  %916 = vmatpush.msra.mxu3 %v668_v50 }
 0x2b5   : > { %917 = vmatpush.msra.mxu3 %v667_v51 }
 0x2b7   : > { %918 = vmatpush.msra.mxu3 %v666_v52 }
 0x2b9   : > { %919 = vmatpush.msra.mxu3 %v665_v53 }
 0x2bb   : > { %920 = vmatpush.msra.mxu3 %v664_v54 }
 0x2bd   : > { %921 = vmatpush.msra.mxu3 %v663_v55 }
 0x2bf   : > { %922 = vmatpush.msra.mxu3 %v662_v56 }
 0x2c1   : > { %923 = vmatpush.msra.mxu3 %v661_v57 }
 0x2c3   : > { %924 = vmatpush.msra.mxu3 %v660_v58 }
 0x2c5   : > { %925 = vmatpush.msra.mxu3 %v659_v59 }
 0x2c7   : > { %926 = vmatpush.msra.mxu3 %v658_v60 }
 0x31d   : > { %v2535_v14 = vpop.permute.xlu0 %2534 }
 0x31e   : > { %v2537_v16 = vunpack.i.h.bf16 %v2535_v14  ;;  %v2536_v17 = vunpack.i.l.bf16 %v2535_v14 }
 0x320   : > { %v710_v19 = vsel %vm706_vm0, %v2828_v15, %v2536_v17  ;;  %v709_v20 = vsel %vm706_vm0, %v2830_v18, %v2537_v16 }
 0x321   : > { %740 = vmatpush.msra.mxu0 %v710_v19  ;;  %786 = vmatpush.msra.mxu1 %v710_v19 }
 0x322   : > { %832 = vmatpush.msra.mxu2 %v710_v19 }
 0x323   : > { %741 = vmatpush.msra.mxu0 %v709_v20  ;;  %787 = vmatpush.msra.mxu1 %v709_v20 }
 0x324   : > { %833 = vmatpush.msra.mxu2 %v709_v20 }
 0x325   : > { %v2540_v21 = vpop.permute.xlu0 %2539 }
 0x326   : > { %v2542_v23 = vunpack.i.h.bf16 %v2540_v21  ;;  %v2541_v24 = vunpack.i.l.bf16 %v2540_v21 }
 0x328   : > { %v708_v26 = vsel %vm706_vm0, %v2836_v22, %v2541_v24  ;;  %v707_v28 = vsel %vm706_vm0, %v2838_v25, %v2542_v23  ;;  %v2553_v24 = vld [vmem:[%s3500_s6] ss:$0 sm:$0xff] }
 0x329   : > { %742 = vmatpush.msra.mxu0 %v708_v26  ;;  %788 = vmatpush.msra.mxu1 %v708_v26 }
 0x32a   : > { %834 = vmatpush.msra.mxu2 %v708_v26 }
 0x32b   : > { %743 = vmatpush.msra.mxu0 %v707_v28  ;;  %789 = vmatpush.msra.mxu1 %v707_v28 }
 0x32c   : > { %835 = vmatpush.msra.mxu2 %v707_v28  ;;  %2363 = vmatmul.msk.f32.vlgmr.msra.gmra.mxu1 %vm715_vm1, %v2842_v27 }
 0x32d   : > { %2367 = vmatmul.msk.f32.vlgmr.msra.gmra.mxu2 %vm715_vm1, %v2846_v29  ;;  %2359 = vmatmul.msk.f32.vlgmr.msra.gmra.mxu0 %vm715_vm1, %v2848_v30 }
 0x334   : > { %2364 = vmatmul.msk.f32.gmra.mxu1 %vm715_vm1, %v2856_v31 }
 0x335   : > { %2368 = vmatmul.msk.f32.gmra.mxu2 %vm715_vm1, %v2858_v32  ;;  %2360 = vmatmul.msk.f32.gmra.mxu0 %vm715_vm1, %v2860_v33 }
 0x33c   : > { %2365 = vmatmul.msk.f32.gmra.mxu1 %vm715_vm1, %v2868_v34 }
 0x33d   : > { %2369 = vmatmul.msk.f32.gmra.mxu2 %vm715_vm1, %v2870_v35  ;;  %2361 = vmatmul.msk.f32.gmra.mxu0 %vm715_vm1, %v2884_v38 }
 0x344   : > { %2366 = vmatmul.msk.f32.gmra.mxu1 %vm715_vm1, %v2876_v36 }
 0x345   : > { %2370 = vmatmul.msk.f32.gmra.mxu2 %vm715_vm1, %v2878_v37  ;;  %2362 = vmatmul.msk.f32.gmra.mxu0 %vm715_vm1, %v2888_v39 }
 0x3a9   : > { %v791_v40 = vpop.f32.mrf.mxu1 }
 0x3aa   : > { %853 = vrot.lane.b32.xlu1 %v791_v40, %s2664_s16  ;;  %v745_v61 = vpop.f32.mrf.mxu0 }
 0x3b0   : > { %v837_v41 = vpop.f32.mrf.mxu2 }
 0x3b1   : > { %v794_v42 = vpop.f32.mrf.mxu1 }
 0x3b2   : > { %869 = vrot.lane.b32.xlu1 %v837_v41, %s2665_s17  ;;  %855 = vrot.lane.b32.xlu2 %v794_v42, %s2664_s16  ;;  %v748_v0 = vpop.f32.mrf.mxu0 }
 0x3b8   : > { %v840_v43 = vpop.f32.mrf.mxu2 }
 0x3b9   : > { %v797_v44 = vpop.f32.mrf.mxu1 }
 0x3ba   : > { %871 = vrot.lane.b32.xlu2 %v840_v43, %s2665_s17  ;;  %857 = vrot.lane.b32.xlu0 %v797_v44, %s2664_s16  ;;  %v751_v6 = vpop.f32.mrf.mxu0 }
 0x3c0   : > { %v843_v45 = vpop.f32.mrf.mxu2 }
 0x3c1   : > { %873 = vrot.lane.b32.xlu1 %v843_v45, %s2665_s17  ;;  %v800_v46 = vpop.f32.mrf.mxu1 }
 0x3c2   : > { %859 = vrot.lane.b32.xlu2 %v800_v46, %s2664_s16  ;;  %v754_v19 = vpop.f32.mrf.mxu0 }
 0x3c8   : > { %v846_v47 = vpop.f32.mrf.mxu2 }
 0x3c9   : > { %875 = vrot.lane.b32.xlu0 %v846_v47, %s2665_s17 }
 0x40c   : > { %v856_v63 = vpop.permute.xlu2 %855 }
 0x40d   : > { %v883_v4 = vsel %vm881_vm3, %v748_v0, %v856_v63 }
 0x414   : > { %v872_v5 = vpop.permute.xlu2 %871 }
 0x415   : > { %v888_v7 = vsel %vm886_vm5, %v883_v4, %v872_v5 }
 0x41c   : > { %v854_v62 = vpop.permute.xlu1 %853  ;;  %v860_v17 = vpop.permute.xlu2 %859 }
 0x41d   : > { %v882_v1 = vsel %vm881_vm3, %v745_v61, %v854_v62  ;;  %v885_v20 = vsel %vm881_vm3, %v754_v19, %v860_v17 }
 0x424   : > { %v870_v2 = vpop.permute.xlu1 %869 }
 0x425   : > { %v887_v3 = vsel %vm886_vm5, %v882_v1, %v870_v2 }
 0x426   : > { %2372 = vmatmul.msk.f32.vlgmr.msra.gmra.mxu3 %vm894_vm4, %v887_v3 }
 0x42c   : > { %v858_v10 = vpop.permute.xlu0 %857 }
 0x42d   : > { %v884_v13 = vsel %vm881_vm3, %v751_v6, %v858_v10 }
 0x42e   : > { %2373 = vmatmul.msk.f32.gmra.mxu3 %vm894_vm4, %v888_v7 }
 0x433   : > { %v874_v14 = vpop.permute.xlu1 %873 }
 0x434   : > { %v889_v16 = vsel %vm886_vm5, %v884_v13, %v874_v14 }
 0x436   : > { %2374 = vmatmul.msk.f32.gmra.mxu3 %vm894_vm4, %v889_v16 }
 0x43b   : > { %v876_v21 = vpop.permute.xlu0 %875 }
 0x43c   : > { %v890_v23 = vsel %vm886_vm5, %v885_v20, %v876_v21 }
 0x43e   : > { %2375 = vmatmul.msk.f32.gmra.mxu3 %vm894_vm4, %v890_v23 }
 0x4a9   : > { %v928_v26 = vpop.f32.mrf.mxu3 }
 0x4aa   : > { %v929_v28 = vadd.f32 %v2553_v24, %v928_v26 }
 0x4ac   : > { %v2376_v40 = vmul.f32 -1.442695, %v929_v28 }
 0x4ae   : > { %2555 = vpow2.f32 %v2376_v40 }
 0x4b1   : > { %v931_v41 = vpop.f32.mrf.mxu3 }
 0x4b2   : > { %v932_v42 = vadd.f32 %v2553_v24, %v931_v41 }
 0x4b4   : > { %v2556_v43 = vpop.eup %2555  ;;  %v2377_v44 = vmul.f32 -1.442695, %v932_v42 }
 0x4b5   : > { %v952_v45 = vadd.f32 1.0, %v2556_v43 }
 0x4b6   : > { %2557 = vpow2.f32 %v2377_v44 }
 0x4b7   : > { %2559 = vrcp.f32 %v952_v45  ;;  %v967_v63 = vand.u32 2147483648, %v952_v45  ;;  %vm961_vm7 = vweird.f32 %v952_v45  ;;  %v965_v1 = vand.u32 2147483647, %v952_v45 }
 0x4b9   : > { %v934_v46 = vpop.f32.mrf.mxu3  ;;  %v968_v6 = vor.u32 1.1754944e-38, %v967_v63  ;;  %vm966_vm10 = vcmp.eq.f32.partialorder %v965_v1, 8.507059e+37 }
 0x4ba   : > { %v935_v47 = vadd.f32 %v2553_v24, %v934_v46 }
 0x4bc   : > { %v2558_v48 = vpop.eup %2557  ;;  %v2378_v49 = vmul.f32 -1.442695, %v935_v47 }
 0x4bd   : > { %v2560_v50 = vpop.eup %2559  ;;  %v953_v51 = vadd.f32 1.0, %v2558_v48 }
 0x4be   : > { %v957_v52 = vmul.f32 %v2560_v50, %v952_v45  ;;  %2561 = vpow2.f32 %v2378_v49  ;;  %vm962_vm6 = vweird.f32 %v2560_v50 }
 0x4bf   : > { %2563 = vrcp.f32 %v953_v51  ;;  %vm963_vm8 = vmor %vm961_vm7, %vm962_vm6  ;;  %v982_v2 = vand.u32 2147483648, %v953_v51  ;;  %v980_v5 = vand.u32 2147483647, %v953_v51  ;;  %vm976_vm11 = vweird.f32 %v953_v51 }
 0x4c0   : > { %v958_v53 = vsub.f32 1.0, %v957_v52 }
 0x4c1   : > { %v937_v54 = vpop.f32.mrf.mxu3  ;;  %v983_v17 = vor.u32 1.1754944e-38, %v982_v2  ;;  %vm981_vm13 = vcmp.eq.f32.partialorder %v980_v5, 8.507059e+37 }
 0x4c2   : > { %v938_v55 = vadd.f32 %v2553_v24, %v937_v54  ;;  %v959_v56 = vmul.f32 %v2560_v50, %v958_v53 }
 0x4c4   : > { %v2562_v57 = vpop.eup %2561  ;;  %v2379_v58 = vmul.f32 -1.442695, %v938_v55  ;;  %v960_v62 = vadd.f32 %v2560_v50, %v959_v56 }
 0x4c5   : > { %v2564_v59 = vpop.eup %2563  ;;  %v954_v60 = vadd.f32 1.0, %v2562_v57 }
 0x4c6   : > { %v972_v61 = vmul.f32 %v2564_v59, %v953_v51  ;;  %2565 = vpow2.f32 %v2379_v58  ;;  %v964_v3 = vsel %vm963_vm8, %v2560_v50, %v960_v62  ;;  %vm977_vm9 = vweird.f32 %v2564_v59 }
 0x4c7   : > { %2567 = vrcp.f32 %v954_v60  ;;  %v2955_v16 = vsel %vm966_vm10, %v968_v6, %v964_v3  ;;  %vm978_vm12 = vmor %vm976_vm11, %vm977_vm9  ;;  %v997_v44 = vand.u32 2147483648, %v954_v60  ;;  %vm991_vm15 = vweird.f32 %v954_v60  ;;  %v672_v6 = vld [vmem:[%s3501_s7] sm:$0xff] }
 0x4c8   : > { %v973_v0 = vsub.f32 1.0, %v972_v61  ;;  %v1016_v24 = vmul.f32 %v2955_v16, %v2817_v11  ;;  %v995_v46 = vand.u32 2147483647, %v954_v60 }
 0x4c9   : > { %v998_v51 = vor.u32 1.1754944e-38, %v997_v44 }
 0x4ca   : > { %v974_v4 = vmul.f32 %v2564_v59, %v973_v0  ;;  %vm996_vm8 = vcmp.eq.f32.partialorder %v995_v46, 8.507059e+37 }
 0x4cc   : > { %v2566_v7 = vpop.eup %2565  ;;  %v975_v10 = vadd.f32 %v2564_v59, %v974_v4 }
 0x4cd   : > { %v2568_v13 = vpop.eup %2567  ;;  %v955_v14 = vadd.f32 1.0, %v2566_v7 }
 0x4ce   : > { %v987_v19 = vmul.f32 %v2568_v13, %v954_v60  ;;  %v979_v20 = vsel %vm978_vm12, %v2564_v59, %v975_v10  ;;  %vm992_vm14 = vweird.f32 %v2568_v13 }
 0x4cf   : > { %2569 = vrcp.f32 %v955_v14  ;;  %v2957_v21 = vsel %vm981_vm13, %v983_v17, %v979_v20  ;;  %vm993_vm6 = vmor %vm991_vm15, %vm992_vm14  ;;  %v1012_v47 = vand.u32 2147483648, %v955_v14  ;;  %v1010_v50 = vand.u32 2147483647, %v955_v14 }
 0x4d0   : > { %v988_v23 = vsub.f32 1.0, %v987_v19  ;;  %v1017_v26 = vmul.f32 %v2957_v21, %v2819_v12  ;;  %vm1006_vm9 = vweird.f32 %v955_v14 }
 0x4d1   : > { %v1013_v54 = vor.u32 1.1754944e-38, %v1012_v47  ;;  %vm1011_vm11 = vcmp.eq.f32.partialorder %v1010_v50, 8.507059e+37 }
 0x4d2   : > { %v2548_v28 = vpack.i.bf16 %v1016_v24, %v1017_v26  ;;  %v989_v40 = vmul.f32 %v2568_v13, %v988_v23 }
 0x4d4   : > { %2549 = vrot.lane.b32.xlu2 %v2548_v28, %s2663_s26  ;;  %v990_v43 = vadd.f32 %v2568_v13, %v989_v40 }
 0x4d5   : > { %v2570_v41 = vpop.eup %2569 }
 0x4d6   : > { %v1002_v42 = vmul.f32 %v2570_v41, %v955_v14  ;;  %v994_v48 = vsel %vm993_vm6, %v2568_v13, %v990_v43  ;;  %vm1007_vm7 = vweird.f32 %v2570_v41 }
 0x4d7   : > { %v2964_v53 = vsel %vm996_vm8, %v998_v51, %v994_v48  ;;  %vm1008_vm10 = vmor %vm1006_vm9, %vm1007_vm7 }
 0x4d8   : > { %v1003_v45 = vsub.f32 1.0, %v1002_v42  ;;  %v1018_v57 = vmul.f32 %v2964_v53, %v2810_v8 }
 0x4da   : > { %v1004_v49 = vmul.f32 %v2570_v41, %v1003_v45 }
 0x4dc   : > { %v1005_v52 = vadd.f32 %v2570_v41, %v1004_v49  ;;  %v2554_v49 = vld [vmem:[%s3502_s8] ss:$0 sm:$0xff] }
 0x4de   : > { %v1009_v55 = vsel %vm1008_vm10, %v2570_v41, %v1005_v52 }
 0x4df   : > { %v2966_v56 = vsel %vm1011_vm11, %v1013_v54, %v1009_v55 }
 0x4e0   : > { %v1019_v58 = vmul.f32 %v2966_v56, %v2812_v9 }
 0x4e2   : > { %v2543_v59 = vpack.i.bf16 %v1018_v57, %v1019_v58 }
 0x4e4   : > { %2544 = vrot.lane.b32.xlu1 %v2543_v59, %s2663_s26 }
 0x52e   : > { %v2550_v60 = vpop.permute.xlu2 %2549 }
 0x52f   : > { %v2551_v0 = vunpack.i.l.bf16 %v2550_v60  ;;  %v2552_v2 = vunpack.i.h.bf16 %v2550_v60 }
 0x531   : > { %v1037_v4 = vsel %vm706_vm0, %v2836_v22, %v2551_v0  ;;  %v1036_v5 = vsel %vm706_vm0, %v2838_v25, %v2552_v2 }
 0x556   : > { %v2545_v61 = vpop.permute.xlu1 %2544 }
 0x557   : > { %v2547_v62 = vunpack.i.h.bf16 %v2545_v61  ;;  %v2546_v63 = vunpack.i.l.bf16 %v2545_v61 }
 0x559   : > { %v1039_v1 = vsel %vm706_vm0, %v2828_v15, %v2546_v63  ;;  %v1038_v3 = vsel %vm706_vm0, %v2830_v18, %v2547_v62 }
 0x55a   : > { %1052 = vmatpush.msrb.mxu0 %v1039_v1  ;;  %1081 = vmatpush.msrb.mxu1 %v1039_v1 }
 0x55b   : > { %1110 = vmatpush.msrb.mxu2 %v1039_v1 }
 0x55c   : > { %1053 = vmatpush.msrb.mxu0 %v1038_v3  ;;  %1082 = vmatpush.msrb.mxu1 %v1038_v3 }
 0x55d   : > { %1111 = vmatpush.msrb.mxu2 %v1038_v3  ;;  %v1236_v3 = vsub.f32 1.0, %v2964_v53 }
 0x55e   : > { %1054 = vmatpush.msrb.mxu0 %v1037_v4  ;;  %1083 = vmatpush.msrb.mxu1 %v1037_v4 }
 0x55f   : > { %1112 = vmatpush.msrb.mxu2 %v1037_v4 }
 0x560   : > { %1055 = vmatpush.msrb.mxu0 %v1036_v5  ;;  %1084 = vmatpush.msrb.mxu1 %v1036_v5 }
 0x561   : > { %1113 = vmatpush.msrb.mxu2 %v1036_v5  ;;  %2384 = vmatmul.msk.f32.vlgmr.msrb.gmra.mxu1 %vm715_vm1, %v2842_v27 }
 0x562   : > { %2388 = vmatmul.msk.f32.vlgmr.msrb.gmra.mxu2 %vm715_vm1, %v2846_v29  ;;  %2380 = vmatmul.msk.f32.vlgmr.msrb.gmra.mxu0 %vm715_vm1, %v2848_v30  ;;  %v684_v29 = vld [vmem:[%s3501_s7 + $0x60] sm:$0x3f]  ;;  %v683_v30 = vld [vmem:[%s3501_s7 + $0x58] sm:$0xff] }
 0x563   : > { %2477 = vmatpush.msk.msrb.mxu3 %vm907_vm2, %v684_v29  ;;  %2392 = vmatpush.msk.msra.mxu0 %vm907_vm2, %v684_v29 }
 0x565   : > { %2478 = vmatpush.msrb.mxu3 %v683_v30  ;;  %1189 = vmatpush.msra.mxu0 %v683_v30 }
 0x569   : > { %2385 = vmatmul.msk.f32.gmra.mxu1 %vm715_vm1, %v2856_v31  ;;  %v682_v31 = vld [vmem:[%s3501_s7 + $0x50] sm:$0xff] }
 0x56a   : > { %2389 = vmatmul.msk.f32.gmra.mxu2 %vm715_vm1, %v2858_v32  ;;  %2381 = vmatmul.msk.f32.gmra.mxu0 %vm715_vm1, %v2860_v33  ;;  %v681_v32 = vld [vmem:[%s3501_s7 + $0x48] sm:$0xff] }
 0x56b   : > { %2479 = vmatpush.msrb.mxu3 %v682_v31  ;;  %1190 = vmatpush.msra.mxu0 %v682_v31 }
 0x56d   : > { %2480 = vmatpush.msrb.mxu3 %v681_v32  ;;  %1191 = vmatpush.msra.mxu0 %v681_v32  ;;  %v1234_v32 = vsub.f32 1.0, %v2955_v16 }
 0x571   : > { %2386 = vmatmul.msk.f32.gmra.mxu1 %vm715_vm1, %v2868_v34 }
 0x572   : > { %2390 = vmatmul.msk.f32.gmra.mxu2 %vm715_vm1, %v2870_v35  ;;  %2382 = vmatmul.msk.f32.gmra.mxu0 %vm715_vm1, %v2884_v38  ;;  %v674_v38 = vld [vmem:[%s3501_s7 + $0x10] sm:$0xff] }
 0x579   : > { %2387 = vmatmul.msk.f32.gmra.mxu1 %vm715_vm1, %v2876_v36  ;;  %v680_v36 = vld [vmem:[%s3501_s7 + $0x40] sm:$0xff] }
 0x57a   : > { %2391 = vmatmul.msk.f32.gmra.mxu2 %vm715_vm1, %v2878_v37  ;;  %2383 = vmatmul.msk.f32.gmra.mxu0 %vm715_vm1, %v2888_v39  ;;  %v679_v37 = vld [vmem:[%s3501_s7 + $0x38] sm:$0xff]  ;;  %v673_v39 = vld [vmem:[%s3501_s7 + $0x8] sm:$0xff] }
 0x57b   : > { %2481 = vmatpush.msrb.mxu3 %v680_v36  ;;  %1192 = vmatpush.msra.mxu0 %v680_v36  ;;  %v1237_v36 = vsub.f32 1.0, %v2966_v56 }
 0x57d   : > { %2482 = vmatpush.msrb.mxu3 %v679_v37  ;;  %1193 = vmatpush.msra.mxu0 %v679_v37 }
 0x5de   : > { %v1086_v15 = vpop.f32.mrf.mxu1 }
 0x5df   : > { %v1057_v7 = vpop.f32.mrf.mxu0 }
 0x5e5   : > { %v1115_v18 = vpop.f32.mrf.mxu2 }
 0x5e6   : > { %v1089_v22 = vpop.f32.mrf.mxu1 }
 0x5e7   : > { %1133 = vrot.lane.b32.xlu0 %v1089_v22, %s2664_s16  ;;  %v1060_v10 = vpop.f32.mrf.mxu0 }
 0x5ed   : > { %v1118_v25 = vpop.f32.mrf.mxu2 }
 0x5ee   : > { %1149 = vrot.lane.b32.xlu1 %v1118_v25, %s2665_s17  ;;  %v1092_v27 = vpop.f32.mrf.mxu1  ;;  %v1235_v25 = vsub.f32 1.0, %v2957_v21 }
 0x5ef   : > { %1135 = vrot.lane.b32.xlu2 %v1092_v27, %s2664_s16  ;;  %v1063_v20 = vpop.f32.mrf.mxu0 }
 0x5f5   : > { %v1121_v33 = vpop.f32.mrf.mxu2 }
 0x5f6   : > { %1151 = vrot.lane.b32.xlu0 %v1121_v33, %s2665_s17  ;;  %v1095_v34 = vpop.f32.mrf.mxu1 }
 0x5f7   : > { %1137 = vrot.lane.b32.xlu1 %v1095_v34, %s2664_s16  ;;  %v1066_v41 = vpop.f32.mrf.mxu0 }
 0x5fd   : > { %v1124_v35 = vpop.f32.mrf.mxu2 }
 0x5fe   : > { %1131 = vrot.lane.b32.xlu0 %v1086_v15, %s2664_s16  ;;  %1153 = vrot.lane.b32.xlu2 %v1124_v35, %s2665_s17 }
 0x5ff   : > { %1147 = vrot.lane.b32.xlu1 %v1115_v18, %s2665_s17 }
 0x606   : > { %1220 = vrot.lane.b32.xlu0 %v2819_v12, %s2666_s14  ;;  %1218 = vrot.lane.b32.xlu2 %v2817_v11, %s2666_s14  ;;  %v678_v11 = vld [vmem:[%s3501_s7 + $0x30] sm:$0xff]  ;;  %v675_v12 = vld [vmem:[%s3501_s7 + $0x18] sm:$0xff] }
 0x607   : > { %1222 = vrot.lane.b32.xlu1 %v2810_v8, %s2666_s14  ;;  %v677_v8 = vld [vmem:[%s3501_s7 + $0x28] sm:$0xff]  ;;  %2483 = vmatpush.msrb.mxu3 %v678_v11 }
 0x608   : > { %1194 = vmatpush.msra.mxu0 %v678_v11 }
 0x609   : > { %2484 = vmatpush.msrb.mxu3 %v677_v8 }
 0x60a   : > { %1195 = vmatpush.msra.mxu0 %v677_v8 }
 0x60e   : > { %1224 = vrot.lane.b32.xlu2 %v2812_v9, %s2666_s14  ;;  %v676_v9 = vld [vmem:[%s3501_s7 + $0x20] sm:$0xff] }
 0x60f   : > { %2485 = vmatpush.msrb.mxu3 %v676_v9  ;;  %1196 = vmatpush.msra.mxu0 %v676_v9 }
 0x611   : > { %2486 = vmatpush.msrb.mxu3 %v675_v12  ;;  %1197 = vmatpush.msra.mxu0 %v675_v12 }
 0x613   : > { %2487 = vmatpush.msrb.mxu3 %v674_v38  ;;  %1198 = vmatpush.msra.mxu0 %v674_v38 }
 0x615   : > { %2488 = vmatpush.msrb.mxu3 %v673_v39  ;;  %1199 = vmatpush.msra.mxu0 %v673_v39 }
 0x617   : > { %2489 = vmatpush.msrb.mxu3 %v672_v6  ;;  %1200 = vmatpush.msra.mxu0 %v672_v6 }
 0x649   : > { %v1136_v23 = vpop.permute.xlu2 %1135 }
 0x64a   : > { %v1161_v24 = vsel %vm881_vm3, %v1063_v20, %v1136_v23 }
 0x658   : > { %v1154_v43 = vpop.permute.xlu2 %1153 }
 0x659   : > { %v1134_v13 = vpop.permute.xlu0 %1133 }
 0x65a   : > { %v1160_v14 = vsel %vm881_vm3, %v1060_v10, %v1134_v13 }
 0x660   : > { %v1150_v17 = vpop.permute.xlu1 %1149  ;;  %v1219_v0 = vpop.permute.xlu2 %1218 }
 0x661   : > { %v1164_v19 = vsel %vm886_vm5, %v1160_v14, %v1150_v17  ;;  %v1230_v34 = vmul.f32 %v1219_v0, %v2955_v16 }
 0x662   : > { %2394 = vmatmul.msk.f32.vlgmr.msrb.gmra.mxu3 %vm894_vm4, %v1164_v19 }
 0x668   : > { %v1152_v26 = vpop.permute.xlu0 %1151  ;;  %v1225_v1 = vpop.permute.xlu2 %1224 }
 0x669   : > { %v1138_v28 = vpop.permute.xlu1 %1137  ;;  %v1165_v40 = vsel %vm886_vm5, %v1161_v24, %v1152_v26  ;;  %v1233_v11 = vmul.f32 %v1225_v1, %v2966_v56 }
 0x66a   : > { %2395 = vmatmul.msk.f32.gmra.mxu3 %vm894_vm4, %v1165_v40  ;;  %v1162_v42 = vsel %vm881_vm3, %v1066_v41, %v1138_v28 }
 0x66b   : > { %v1166_v47 = vsel %vm886_vm5, %v1162_v42, %v1154_v43 }
 0x670   : > { %v1132_v44 = vpop.permute.xlu0 %1131 }
 0x671   : > { %v1159_v45 = vsel %vm881_vm3, %v1057_v7, %v1132_v44  ;;  %v1148_v46 = vpop.permute.xlu1 %1147 }
 0x672   : > { %v1163_v48 = vsel %vm886_vm5, %v1159_v45, %v1148_v46  ;;  %2396 = vmatmul.msk.f32.gmra.mxu3 %vm894_vm4, %v1166_v47 }
 0x673   : > { %2393 = vmatmul.msk.f32.vlgmr.msra.gmra.mxu0 %vm894_vm4, %v1163_v48 }
 0x678   : > { %v1221_v22 = vpop.permute.xlu0 %1220 }
 0x679   : > { %v1223_v2 = vpop.permute.xlu1 %1222  ;;  %v1231_v29 = vmul.f32 %v1221_v22, %v2957_v21 }
 0x67a   : > { %v1232_v5 = vmul.f32 %v1223_v2, %v2964_v53 }
 0x6e5   : > { %v1205_v50 = vpop.f32.mrf.mxu3 }
 0x6e6   : > { %v1206_v51 = vadd.f32 %v2554_v49, %v1205_v50 }
 0x6e8   : > { %2571 = vtanh.f32 %v1206_v51 }
 0x6ed   : > { %v1208_v52 = vpop.f32.mrf.mxu3 }
 0x6ee   : > { %v2572_v54 = vpop.eup %2571  ;;  %v1209_v55 = vadd.f32 %v2554_v49, %v1208_v52 }
 0x6ef   : > { %1244 = vrot.lane.b32.xlu1 %v2572_v54, %s2666_s14 }
 0x6f0   : > { %2573 = vtanh.f32 %v1209_v55  ;;  %v1202_v57 = vpop.f32.mrf.mxu0 }
 0x6f1   : > { %v1203_v58 = vadd.f32 %v2554_v49, %v1202_v57 }
 0x6f3   : > { %2575 = vtanh.f32 %v1203_v58 }
 0x6f5   : > { %v1211_v59 = vpop.f32.mrf.mxu3 }
 0x6f6   : > { %v2574_v60 = vpop.eup %2573  ;;  %v1212_v61 = vadd.f32 %v2554_v49, %v1211_v59 }
 0x6f7   : > { %1246 = vrot.lane.b32.xlu2 %v2574_v60, %s2666_s14 }
 0x6f8   : > { %2577 = vtanh.f32 %v1212_v61 }
 0x6f9   : > { %v2576_v62 = vpop.eup %2575 }
 0x6fa   : > { %1242 = vrot.lane.b32.xlu0 %v2576_v62, %s2666_s14 }
 0x6fe   : > { %v2578_v63 = vpop.eup %2577 }
 0x702   : > { %1248 = vrot.lane.b32.xlu0 %v2578_v63, %s2666_s14 }
 0x751   : > { %v1247_v4 = vpop.permute.xlu2 %1246 }
 0x752   : > { %v1256_v15 = vmul.f32 %v1247_v4, %v1236_v3 }
 0x754   : > { %v1260_v18 = vadd.f32 %v1256_v15, %v1232_v5 }
 0x756   : > { %1270 = vrot.lane.b32.xlu0 %v1260_v18, %s2667_s27 }
 0x761   : > { %v1245_v27 = vpop.permute.xlu1 %1244 }
 0x762   : > { %v1255_v30 = vmul.f32 %v1245_v27, %v1235_v25 }
 0x764   : > { %v1259_v31 = vadd.f32 %v1255_v30, %v1231_v29 }
 0x766   : > { %1268 = vrot.lane.b32.xlu2 %v1259_v31, %s2667_s27 }
 0x76c   : > { %v1243_v33 = vpop.permute.xlu0 %1242 }
 0x76d   : > { %v1254_v35 = vmul.f32 %v1243_v33, %v1234_v32 }
 0x76f   : > { %v1258_v53 = vadd.f32 %v1254_v35, %v1230_v34 }
 0x771   : > { %1266 = vrot.lane.b32.xlu1 %v1258_v53, %s2667_s27 }
 0x774   : > { %v1249_v37 = vpop.permute.xlu0 %1248 }
 0x775   : > { %v1257_v8 = vmul.f32 %v1249_v37, %v1237_v36 }
 0x777   : > { %v1261_v9 = vadd.f32 %v1257_v8, %v1233_v11 }
 0x779   : > { %1272 = vrot.lane.b32.xlu1 %v1261_v9, %s2667_s27 }
 0x7c0   : > { %v1269_v21 = vpop.permute.xlu2 %1268 }
 0x7c1   : > { %1279 = vst.msk [vmem:[#allocation3 + $0x8] sm:$0xff] %vm715_vm1, %v1269_v21 }
 0x7c8   : > { %v1271_v12 = vpop.permute.xlu0 %1270 }
 0x7c9   : > { %1280 = vst.msk [vmem:[#allocation3 + $0x10] sm:$0xff] %vm715_vm1, %v1271_v12 }
 0x7e3   : > { %v1267_v38 = vpop.permute.xlu1 %1266 }
 0x7e4   : > { %1278 = vst.msk [vmem:[#allocation3] sm:$0xff] %vm715_vm1, %v1267_v38 }
 0x7eb   : > { %v1273_v16 = vpop.permute.xlu1 %1272 }
 0x7ec   : > { %1281 = vst.msk [vmem:[#allocation3 + $0x18] sm:$0xff] %vm715_vm1, %v1273_v16 }
 0x7ed PF: > { %p2397_p5 = scmp.ne.s32.totalorder %s2765_s21, 8 }
 0x7ee   : > { %s2668_s17 = smov (!%p2397_p5), 16  }
 0x7ef   : > { %1285 = sbr.rel (%p2397_p5) target bundleno = 2878 (0xb3e), region = 92 }
 0x7f4   : > { %v1293_v56 = vld [vmem:[%s3497_s3 + $0x18] sm:$0xff]  ;;  %v1292_v39 = vld [vmem:[%s3497_s3 + $0x10] sm:$0xff]  ;;  %v1291_v6 = vld [vmem:[%s3497_s3 + $0x8] sm:$0xff]  ;;  %vm1298_vm0 = vcmask 261120   ;;  %vm1340_vm1 = vcmask 64512   ;;  %vm1372_vm2 = vcmask 130048  }
 0x7f5   : > { %1323 = vmatpush.msra.mxu0 %v1293_v56  ;;  %2490 = vmatpush.msra.mxu1 %v1293_v56  ;;  %v1290_v7 = vld [vmem:[%s3497_s3] sm:$0xff]  ;;  %v1289_v13 = vld [vmem:[#allocation3 + $0x18] sm:$0xff]  ;;  %v1287_v14 = vld [vmem:[#allocation3 + $0x8] sm:$0xff] }
 0x7f6   : > { %v1286_v10 = vld [vmem:[#allocation3] sm:$0xff]  ;;  %v1288_v17 = vld [vmem:[#allocation3 + $0x10] sm:$0xff] }
 0x7f7   : > { %1324 = vmatpush.msra.mxu0 %v1292_v39  ;;  %2491 = vmatpush.msra.mxu1 %v1292_v39  ;;  %v2579_v19 = vld [vmem:[%s3498_s4] ss:$0 sm:$0xff] }
 0x7f9   : > { %1325 = vmatpush.msra.mxu0 %v1291_v6  ;;  %2492 = vmatpush.msra.mxu1 %v1291_v6 }
 0x7fb   : > { %1326 = vmatpush.msra.mxu0 %v1290_v7  ;;  %2493 = vmatpush.msra.mxu1 %v1290_v7 }
 0x7fc   : > { %2398 = vmatmul.msk.f32.vlgmr.msra.gmra.mxu0 %vm1298_vm0, %v1286_v10  ;;  %2401 = vmatmul.msk.f32.vlgmr.msra.gmra.mxu1 %vm1298_vm0, %v1289_v13 }
 0x804   : > { %2399 = vmatmul.msk.f32.gmra.mxu0 %vm1298_vm0, %v1287_v14 }
 0x80c   : > { %2400 = vmatmul.msk.f32.gmra.mxu0 %vm1298_vm0, %v1288_v17 }
 0x879   : > { %v1328_v20 = vpop.f32.mrf.mxu0  ;;  %v1337_v23 = vpop.f32.mrf.mxu1 }
 0x87a   : > { %v1338_v24 = vadd.f32 %v2579_v19, %v1337_v23  ;;  %v1329_v40 = vadd.f32 %v2579_v19, %v1328_v20 }
 0x87c   : > { %2406 = vmatpush.xpose.msk.msra.mxu2 %vm1340_vm1, %v1338_v24 }
 0x881   : > { %v1331_v26 = vpop.f32.mrf.mxu0 }
 0x882   : > { %v1332_v28 = vadd.f32 %v2579_v19, %v1331_v26 }
 0x884   : > { %2402 = vmatpush.xpose.msk.msrb.mxu1 %vm1340_vm1, %v1332_v28 }
 0x888   : > { %2403 = vmatpush.xpose.msk.msrb.mxu1 %vm1340_vm1, %v1329_v40 }
 0x889   : > { %v1334_v41 = vpop.f32.mrf.mxu0 }
 0x88a   : > { %v1335_v42 = vadd.f32 %v2579_v19, %v1334_v41 }
 0x88b   : > { %2404 = vmatmul.msk.f32.vlgmr.msrb.gmra.mxu1 %vm1340_vm1, %v1329_v40 }
 0x88c   : > { %2407 = vmatpush.xpose.msk.msra.mxu2 %vm1340_vm1, %v1335_v42 }
 0x88f   : > { %2408 = vmatmul.msk.f32.vlgmr.msra.gmra.mxu2 %vm1340_vm1, %v1335_v42 }
 0x893   : > { %2405 = vmatmul.msk.f32.gmra.mxu1 %vm1340_vm1, %v1332_v28 }
 0x897   : > { %2409 = vmatmul.msk.f32.gmra.mxu2 %vm1340_vm1, %v1338_v24 }
 0x908   : > { %v1364_v43 = vpop.f32.mrf.mxu1 }
 0x909   : > { %v1370_v48 = vmax.f32 %v1364_v43, 0.0 }
 0x90b   : > { %v1373_v51 = vsel %vm1372_vm2, %v1370_v48, -inf }
 0x910   : > { %v1367_v44 = vpop.f32.mrf.mxu1 }
 0x911   : > { %v1371_v45 = vmax.f32 %v1367_v44, 0.0 }
 0x912   : > { %v1444_v46 = vpop.f32.mrf.mxu2 }
 0x913   : > { %v1376_v47 = vsel %vm1372_vm2, %v1371_v45, -inf  ;;  %v1450_v54 = vmax.f32 %v1444_v46, 0.0 }
 0x914   : > { %1377 = vmax.xlane.f32.xlu1 %v1376_v47 }
 0x915   : > { %v1452_v55 = vsel %vm1372_vm2, %v1450_v54, -inf }
 0x91a   : > { %v1447_v49 = vpop.f32.mrf.mxu2 }
 0x91b   : > { %v1451_v50 = vmax.f32 %v1447_v49, 0.0 }
 0x91c   : > { %1374 = vmax.xlane.f32.xlu1 %v1373_v51 }
 0x91d   : > { %v1455_v52 = vsel %vm1372_vm2, %v1451_v50, -inf }
 0x91e   : > { %1456 = vmax.xlane.f32.xlu0 %v1455_v52 }
 0x926   : > { %1453 = vmax.xlane.f32.xlu0 %v1452_v55 }
 0x987   : > { %v1378_v57 = vpop.xlane.xlu1 %1377 }
 0x988   : > { %v1380_v58 = vsub.f32 %v1371_v45, %v1378_v57 }
 0x98a   : > { %v1383_v59 = vmul.f32 1.442695, %v1380_v58 }
 0x98c   : > { %2580 = vpow2.f32 %v1383_v59 }
 0x98f   : > { %v1375_v60 = vpop.xlane.xlu1 %1374 }
 0x990   : > { %v1379_v61 = vsub.f32 %v1370_v48, %v1375_v60 }
 0x991   : > { %v1457_v62 = vpop.xlane.xlu0 %1456 }
 0x992   : > { %v2581_v63 = vpop.eup %2580  ;;  %v1381_v0 = vmul.f32 1.442695, %v1379_v61  ;;  %v1459_v1 = vsub.f32 %v1451_v50, %v1457_v62 }
 0x993   : > { %v1388_v2 = vsel %vm1372_vm2, %v2581_v63, 0.0 }
 0x994   : > { %2582 = vpow2.f32 %v1381_v0  ;;  %v1462_v3 = vmul.f32 1.442695, %v1459_v1  ;;  %1389 = vadd.xlane.f32.xlu0 %v1388_v2  ;;  %v1512_v1 = vlaneseq }
 0x996   : > { %2584 = vpow2.f32 %v1462_v3  ;;  %v1513_v2 = vshrl.u32 %v1512_v1, 7  ;;  %v1518_v3 = vand.u32 127, %v1512_v1 }
 0x999   : > { %v1454_v4 = vpop.xlane.xlu0 %1453 }
 0x99a   : > { %v3118_v5 = vpop.eup %2582  ;;  %v1458_v15 = vsub.f32 %v1450_v54, %v1454_v4  ;;  %v2669_v4 = vmov 0.0  }
 0x99b   : > { %v1385_v18 = vsel %vm1372_vm2, %v3118_v5, 0.0 }
 0x99c   : > { %v3122_v22 = vpop.eup %2584  ;;  %v1460_v25 = vmul.f32 1.442695, %v1458_v15  ;;  %1386 = vadd.xlane.f32.xlu1 %v1385_v18 }
 0x99d   : > { %v1467_v27 = vsel %vm1372_vm2, %v3122_v22, 0.0 }
 0x99e   : > { %2586 = vpow2.f32 %v1460_v25  ;;  %1468 = vadd.xlane.f32.xlu2 %v1467_v27  ;;  %v1515_v27 = vadd.s32 16, %v1513_v2 }
 0x9a4   : > { %v3126_v29 = vpop.eup %2586 }
 0x9a5   : > { %v1464_v30 = vsel %vm1372_vm2, %v3126_v29, 0.0 }
 0x9a6   : > { %1465 = vadd.xlane.f32.xlu2 %v1464_v30  ;;  %v1516_v30 = vadd.s32 24, %v1513_v2 }
 0xa07   : > { %v1390_v31 = vpop.xlane.xlu0 %1389 }
 0xa08   : > { %2588 = vrcp.f32 %v1390_v31  ;;  %v1417_v36 = vand.u32 2147483648, %v1390_v31  ;;  %v1415_v11 = vand.u32 2147483647, %v1390_v31  ;;  %vm1411_vm4 = vweird.f32 %v1390_v31 }
 0xa0a   : > { %v1418_v21 = vor.u32 1.1754944e-38, %v1417_v36  ;;  %vm1416_vm12 = vcmp.eq.f32.partialorder %v1415_v11, 8.507059e+37 }
 0xa0e   : > { %v2589_v32 = vpop.eup %2588 }
 0xa0f   : > { %v1407_v33 = vmul.f32 %v2589_v32, %v1390_v31  ;;  %v1387_v34 = vpop.xlane.xlu1 %1386  ;;  %vm1412_vm3 = vweird.f32 %v2589_v32 }
 0xa10   : > { %2590 = vrcp.f32 %v1387_v34  ;;  %vm1413_vm5 = vmor %vm1411_vm4, %vm1412_vm3  ;;  %v1400_v13 = vand.u32 2147483647, %v1387_v34  ;;  %v1402_v14 = vand.u32 2147483648, %v1387_v34  ;;  %vm1396_vm14 = vweird.f32 %v1387_v34 }
 0xa11   : > { %v1408_v35 = vsub.f32 1.0, %v1407_v33  ;;  %v1469_v53 = vpop.xlane.xlu2 %1468 }
 0xa12   : > { %2592 = vrcp.f32 %v1469_v53  ;;  %v1496_v23 = vand.u32 2147483648, %v1469_v53  ;;  %v1494_v28 = vand.u32 2147483647, %v1469_v53  ;;  %v1403_v40 = vor.u32 1.1754944e-38, %v1402_v14 }
 0xa13   : > { %v1409_v37 = vmul.f32 %v2589_v32, %v1408_v35  ;;  %vm1401_vm7 = vcmp.eq.f32.partialorder %v1400_v13, 8.507059e+37  ;;  %vm1490_vm8 = vweird.f32 %v1469_v53 }
 0xa14   : > { %v1497_v44 = vor.u32 1.1754944e-38, %v1496_v23  ;;  %vm1495_vm10 = vcmp.eq.f32.partialorder %v1494_v28, 8.507059e+37 }
 0xa15   : > { %v1410_v8 = vadd.f32 %v2589_v32, %v1409_v37 }
 0xa16   : > { %v2591_v9 = vpop.eup %2590 }
 0xa17   : > { %v1392_v12 = vmul.f32 %v2591_v9, %v1387_v34  ;;  %v1414_v38 = vsel %vm1413_vm5, %v2589_v32, %v1410_v8  ;;  %vm1397_vm13 = vweird.f32 %v2591_v9  ;;  %vm2414_vm5 = vmneg %vm1372_vm2 }
 0xa18   : > { %v2593_v16 = vpop.eup %2592  ;;  %v1419_v56 = vsel %vm1416_vm12, %v1418_v21, %v1414_v38  ;;  %vm1398_vm6 = vmor %vm1396_vm14, %vm1397_vm13  ;;  %vm1519_vm12 = vcmp.eq.s32.totalorder %v1513_v2, %v1518_v3  ;;  %vm1594_vm14 = vcmask 7168  }
 0xa19   : > { %v1393_v39 = vsub.f32 1.0, %v1392_v12  ;;  %v1486_v6 = vmul.f32 %v2593_v16, %v1469_v53  ;;  %v1466_v7 = vpop.xlane.xlu2 %1465  ;;  %v3130_v10 = vmul.f32 %v2581_v63, %v1419_v56  ;;  %vm1491_vm15 = vweird.f32 %v2593_v16  ;;  %1595 = vst.msk [vmem:[#allocation4] sm:$0xff] %vm1594_vm14, %v2669_v4 }
 0xa1a   : > { %2594 = vrcp.f32 %v1466_v7  ;;  %vm1492_vm9 = vmor %vm1490_vm8, %vm1491_vm15  ;;  %v1481_v54 = vand.u32 2147483648, %v1466_v7  ;;  %v1479_v57 = vand.u32 2147483647, %v1466_v7  ;;  %vm1475_vm1 = vweird.f32 %v1466_v7  ;;  %1596 = vst.msk [vmem:[#allocation4 + $0x8] sm:$0xff] %vm1594_vm14, %v2669_v4 }
 0xa1b   : > { %v1394_v17 = vmul.f32 %v2591_v9, %v1393_v39  ;;  %v1487_v19 = vsub.f32 1.0, %v1486_v6  ;;  %v3134_v20 = vsel %vm1372_vm2, %v3130_v10, 0.0  ;;  %1597 = vst.msk [vmem:[#allocation4 + $0x10] sm:$0xff] %vm1594_vm14, %v2669_v4  ;;  %vm1522_vm15 = vcmp.eq.s32.totalorder %v1516_v30, %v1518_v3 }
 0xa1c   : > { %1537 = vst.msk [vmem:[#allocation2 + $0x28] sm:$0xff] %vm1298_vm0, %v3134_v20  ;;  %v1482_v59 = vor.u32 1.1754944e-38, %v1481_v54  ;;  %vm1480_vm4 = vcmp.eq.f32.partialorder %v1479_v57, 8.507059e+37  ;;  %v2413_v31 = vsel %vm1522_vm15, 1.0, %v2669_v4 }
 0xa1d   : > { %v1395_v24 = vadd.f32 %v2591_v9, %v1394_v17  ;;  %v1488_v26 = vmul.f32 %v2593_v16, %v1487_v19  ;;  %1598 = vst.msk [vmem:[#allocation4 + $0x18] sm:$0xff] %vm1594_vm14, %v2669_v4 }
 0xa1e   : > { %1534 = vst.msk [vmem:[#allocation2 + $0x18] sm:$0xff] %vm1298_vm0, %v2413_v31 }
 0xa1f   : > { %v1489_v41 = vadd.f32 %v2593_v16, %v1488_v26  ;;  %v1399_v42 = vsel %vm1398_vm6, %v2591_v9, %v1395_v24 }
 0xa20   : > { %v2595_v43 = vpop.eup %2594  ;;  %v1404_v45 = vsel %vm1401_vm7, %v1403_v40, %v1399_v42 }
 0xa21   : > { %v1471_v46 = vmul.f32 %v2595_v43, %v1466_v7  ;;  %v1493_v47 = vsel %vm1492_vm9, %v2593_v16, %v1489_v41  ;;  %v1405_v48 = vmul.f32 %v3118_v5, %v1404_v45  ;;  %vm1476_vm11 = vweird.f32 %v2595_v43 }
 0xa22   : > { %v1498_v49 = vsel %vm1495_vm10, %v1497_v44, %v1493_v47  ;;  %vm1477_vm3 = vmor %vm1475_vm1, %vm1476_vm11  ;;  %v2410_v5 = vsel %vm1519_vm12, 1.0, %v2669_v4 }
 0xa23   : > { %v1472_v50 = vsub.f32 1.0, %v1471_v46  ;;  %v1499_v51 = vmul.f32 %v3122_v22, %v1498_v49  ;;  %v1500_v52 = vsel %vm1372_vm2, %v1405_v48, 0.0  ;;  %1531 = vst.msk [vmem:[#allocation2] sm:$0xff] %vm1298_vm0, %v2410_v5  ;;  %v1514_v22 = vadd.s32 8, %v1513_v2 }
 0xa24   : > { %1536 = vst.msk [vmem:[#allocation2 + $0x20] sm:$0xff] %vm1298_vm0, %v1500_v52 }
 0xa25   : > { %v1473_v55 = vmul.f32 %v2595_v43, %v1472_v50  ;;  %1506 = vrot.lane.b32.xlu2 %v1499_v51, %s2668_s17  ;;  %vm1520_vm13 = vcmp.eq.s32.totalorder %v1514_v22, %v1518_v3 }
 0xa26   : > { %v2411_v25 = vsel %vm1520_vm13, 1.0, %v2669_v4 }
 0xa27   : > { %v1474_v58 = vadd.f32 %v2595_v43, %v1473_v55  ;;  %1532 = vst.msk [vmem:[#allocation2 + $0x8] sm:$0xff] %vm1298_vm0, %v2411_v25 }
 0xa29   : > { %v1478_v60 = vsel %vm1477_vm3, %v2595_v43, %v1474_v58 }
 0xa2a   : > { %v1483_v61 = vsel %vm1480_vm4, %v1482_v59, %v1478_v60 }
 0xa2b   : > { %v1484_v62 = vmul.f32 %v3126_v29, %v1483_v61 }
 0xa2d   : > { %1504 = vrot.lane.b32.xlu0 %v1484_v62, %s2668_s17 }
 0xa7f   : > { %v1507_v63 = vpop.permute.xlu2 %1506 }
 0xa80   : > { %2415 = vmatpush.msk.msrb.mxu2 %vm2414_vm5, %v1507_v63  ;;  %2494 = vmatpush.msk.msra.mxu3 %vm2414_vm5, %v1507_v63  ;;  %v1511_v0 = vsel %vm1372_vm2, 0.0, %v1507_v63 }
 0xa81   : > { %1539 = vst.msk [vmem:[#allocation2 + $0x38] sm:$0xff] %vm1298_vm0, %v1511_v0 }
 0xa9f   : > { %v1505_v15 = vpop.permute.xlu0 %1504 }
 0xaa0   : > { %2417 = vmatpush.msk.msrb.mxu2 %vm2414_vm5, %v1505_v15  ;;  %2495 = vmatpush.msk.msra.mxu3 %vm2414_vm5, %v1505_v15  ;;  %v1510_v18 = vsel %vm1372_vm2, 0.0, %v1505_v15 }
 0xaa1   : > { %1538 = vst.msk [vmem:[#allocation2 + $0x30] sm:$0xff] %vm1298_vm0, %v1510_v18 }
 0xaa2   : > { %2418 = vmatpush.msk.msrb.mxu2 %vm1372_vm2, %v3130_v10  ;;  %2496 = vmatpush.msk.msra.mxu3 %vm1372_vm2, %v3130_v10 }
 0xaa4   : > { %2419 = vmatpush.msk.msrb.mxu2 %vm1372_vm2, %v1405_v48  ;;  %2497 = vmatpush.msk.msra.mxu3 %vm1372_vm2, %v1405_v48  ;;  %vm1521_vm2 = vcmp.eq.s32.totalorder %v1515_v27, %v1518_v3 }
 0xaa5   : > { %2420 = vmatmul.msk.f32.vlgmr.msrb.gmra.mxu2 %vm1298_vm0, %v1500_v52  ;;  %2421 = vmatmul.msk.f32.vlgmr.msra.gmra.mxu3 %vm1298_vm0, %v3134_v20  ;;  %v2412_v29 = vsel %vm1521_vm2, 1.0, %v2669_v4 }
 0xaa6   : > { %1533 = vst.msk [vmem:[#allocation2 + $0x10] sm:$0xff] %vm1298_vm0, %v2412_v29 }
 0xaad   : > { %2422 = vmatmul.msk.f32.gmra.mxu3 %vm1298_vm0, %v1510_v18 }
 0xab5   : > { %2423 = vmatmul.msk.f32.gmra.mxu3 %vm1298_vm0, %v1511_v0 }
 0xb28   : > { %v1569_v32 = vpop.f32.mrf.mxu2  ;;  %v1572_v33 = vpop.f32.mrf.mxu3 }
 0xb29   : > { %v1581_v34 = vmul.f32 2.0, %v1569_v32  ;;  %v1582_v35 = vmul.f32 2.0, %v1572_v33 }
 0xb2b   : > { %v1585_v53 = vsub.f32 %v1581_v34, %v2410_v5  ;;  %v1586_v36 = vsub.f32 %v1582_v35, %v2411_v25 }
 0xb2d   : > { %1590 = vst.msk [vmem:[#allocation2 + $0x40] sm:$0xff] %vm1298_vm0, %v1585_v53 }
 0xb2e   : > { %1591 = vst.msk [vmem:[#allocation2 + $0x48] sm:$0xff] %vm1298_vm0, %v1586_v36 }
 0xb30   : > { %v1575_v37 = vpop.f32.mrf.mxu3 }
 0xb31   : > { %v1583_v11 = vmul.f32 2.0, %v1575_v37 }
 0xb33   : > { %v1587_v8 = vsub.f32 %v1583_v11, %v2412_v29 }
 0xb35   : > { %1592 = vst.msk [vmem:[#allocation2 + $0x50] sm:$0xff] %vm1298_vm0, %v1587_v8 }
 0xb38   : > { %v1578_v9 = vpop.f32.mrf.mxu3 }
 0xb39   : > { %v1584_v21 = vmul.f32 2.0, %v1578_v9 }
 0xb3b   : > { %v1588_v12 = vsub.f32 %v1584_v21, %v2413_v31 }
 0xb3d   : > { %1593 = vst.msk [vmem:[#allocation2 + $0x58] sm:$0xff] %vm1298_vm0, %v1588_v12 }
 0xb3e PF: > { %p2424_p6 = scmp.lt.s32.totalorder %s2765_s21, 8 }
 0xb3f   : > { %s2425_s26 = sadd.s32 (!%p2424_p6), 4294967288, %s2765_s21  ;;  %s2670_s29 = smov (!%p2424_p6), 1  }
 0xb40   : > { %1602 = sbr.rel (%p2424_p6) target bundleno = 4373 (0x1115), region = 96  ;;  %s3169_s25 = sshll.u32 (!%p2424_p6), %s2425_s26, 5 }
 0xb41   : > { %s1609_s28 = scalar_lea.vmem (!%p2424_p6), %s3495_s1, %s3169_s25  ;;  %s2671_s21 = smov (!%p2424_p6), 2  }
 0xb42   : > { %s2672_s14 = smov (!%p2424_p6), 68   ;;  %s2675_s26 = smov (!%p2424_p6), 96  }
 0xb43   : > { %s2308_s24 = scalar_lea.vmem (!%p2424_p6), %s3509_s15, %s3169_s25 }
 0xb45   : > { %v1612_v38 = vld [vmem:[%s1609_s28 + $0x10] sm:$0xff]  ;;  %v1613_v16 = vld [vmem:[%s1609_s28 + $0x18] sm:$0xff]  ;;  %v1610_v56 = vld [vmem:[%s1609_s28] sm:$0xff]  ;;  %vm1630_vm0 = vcmask 7168   ;;  %vm1683_vm6 = vcmask 15360   ;;  %vm1692_vm7 = vcmask 261120  }
 0xb46   : > { %v2596_v39 = vpack.i.bf16 %v1612_v38, %v1613_v16  ;;  %v1611_v6 = vld [vmem:[%s1609_s28 + $0x8] sm:$0xff]  ;;  %v3175_v10 = vld [vmem:[#allocation3 + $0x10] sm:$0xff]  ;;  %v3177_v13 = vld [vmem:[#allocation3 + $0x18] sm:$0xff]  ;;  %vm1884_vm8 = vcmask 1045504   ;;  %s2673_s28 = smov 34   ;;  %vm1858_vm9 = vcmask 277504  }
 0xb47   : > { %v2606_v7 = vpack.i.bf16 %v1610_v56, %v1611_v6  ;;  %v3179_v14 = vld [vmem:[#allocation3] sm:$0xff]  ;;  %v3181_v17 = vld [vmem:[#allocation3 + $0x8] sm:$0xff]  ;;  %v2601_v19 = vpack.i.bf16 %v3175_v10, %v3177_v13  ;;  %v1607_v28 = vld [vmem:[#allocation4 + $0x18] sm:$0xff]  ;;  %vm1863_vm10 = vcmask 556032   ;;  %vm1871_vm11 = vcmask 834560  }
 0xb48   : > { %2597 = vrot.lane.b32.xlu0 %v2596_v39, %s2670_s29  ;;  %v2611_v20 = vpack.i.bf16 %v3179_v14, %v3181_v17  ;;  %v1606_v45 = vld [vmem:[#allocation4 + $0x10] sm:$0xff]  ;;  %v1605_v50 = vld [vmem:[#allocation4 + $0x8] sm:$0xff]  ;;  %v1604_v57 = vld [vmem:[#allocation4] sm:$0xff] }
 0xb49   : > { %2607 = vrot.lane.b32.xlu1 %v2606_v7, %s2670_s29  ;;  %v3207_v61 = vld [vmem:[#allocation2 + $0x10] sm:$0xff]  ;;  %v3211_v63 = vld [vmem:[#allocation2 + $0x40] sm:$0xff]  ;;  %v3217_v0 = vld [vmem:[#allocation2 + $0x18] sm:$0xff] }
 0xb4a   : > { %v3219_v1 = vld [vmem:[#allocation2 + $0x48] sm:$0xff]  ;;  %v3223_v2 = vld [vmem:[#allocation2] sm:$0xff]  ;;  %v3231_v4 = vld [vmem:[#allocation2 + $0x50] sm:$0xff] }
 0xb4b   : > { %v3229_v3 = vld [vmem:[#allocation2 + $0x20] sm:$0xff]  ;;  %v3237_v5 = vld [vmem:[#allocation2 + $0x28] sm:$0xff]  ;;  %v3239_v15 = vld [vmem:[#allocation2 + $0x58] sm:$0xff] }
 0xb4c   : > { %v3245_v18 = vld [vmem:[#allocation2 + $0x30] sm:$0xff]  ;;  %v3249_v22 = vld [vmem:[#allocation2 + $0x38] sm:$0xff]  ;;  %v3253_v25 = vld [vmem:[#allocation2 + $0x8] sm:$0xff] }
 0xb4d   : > { %v1647_v31 = vld [vmem:[%s3503_s9 + $0x60] sm:$0x3f]  ;;  %v1646_v32 = vld [vmem:[%s3503_s9 + $0x58] sm:$0xff]  ;;  %v1645_v33 = vld [vmem:[%s3503_s9 + $0x50] sm:$0xff] }
 0xb4e   : > { %2439 = vmatpush.msk.msra.mxu3 %vm1884_vm8, %v1647_v31  ;;  %v1644_v34 = vld [vmem:[%s3503_s9 + $0x48] sm:$0xff]  ;;  %v1643_v53 = vld [vmem:[%s3503_s9 + $0x40] sm:$0xff]  ;;  %v1642_v37 = vld [vmem:[%s3503_s9 + $0x38] sm:$0xff] }
 0xb4f   : > { %v1641_v11 = vld [vmem:[%s3503_s9 + $0x30] sm:$0xff]  ;;  %v1640_v8 = vld [vmem:[%s3503_s9 + $0x28] sm:$0xff]  ;;  %v1639_v56 = vld [vmem:[%s3503_s9 + $0x20] sm:$0xff] }
 0xb50   : > { %2602 = vrot.lane.b32.xlu0 %v2601_v19, %s2671_s21  ;;  %1892 = vmatpush.msra.mxu3 %v1646_v32  ;;  %v1638_v39 = vld [vmem:[%s3503_s9 + $0x18] sm:$0xff]  ;;  %v1637_v6 = vld [vmem:[%s3503_s9 + $0x10] sm:$0xff]  ;;  %v1636_v7 = vld [vmem:[%s3503_s9 + $0x8] sm:$0xff] }
 0xb51   : > { %2612 = vrot.lane.b32.xlu1 %v2611_v20, %s2671_s21  ;;  %v1635_v19 = vld [vmem:[%s3503_s9] sm:$0xff] }
 0xb52   : > { %1893 = vmatpush.msra.mxu3 %v1645_v33 }
 0xb54   : > { %1894 = vmatpush.msra.mxu3 %v1644_v34 }
 0xb56   : > { %1895 = vmatpush.msra.mxu3 %v1643_v53 }
 0xb58   : > { %1896 = vmatpush.msra.mxu3 %v1642_v37 }
 0xb5a   : > { %1897 = vmatpush.msra.mxu3 %v1641_v11 }
 0xb5c   : > { %1898 = vmatpush.msra.mxu3 %v1640_v8 }
 0xb5e   : > { %1899 = vmatpush.msra.mxu3 %v1639_v56 }
 0xb60   : > { %1900 = vmatpush.msra.mxu3 %v1638_v39 }
 0xb62   : > { %1901 = vmatpush.msra.mxu3 %v1637_v6 }
 0xb64   : > { %1902 = vmatpush.msra.mxu3 %v1636_v7 }
 0xb66   : > { %1903 = vmatpush.msra.mxu3 %v1635_v19 }
 0xbba   : > { %v2598_v23 = vpop.permute.xlu0 %2597 }
 0xbbb   : > { %v2608_v24 = vpop.permute.xlu1 %2607  ;;  %v2599_v26 = vunpack.i.l.bf16 %v2598_v23  ;;  %v2600_v40 = vunpack.i.h.bf16 %v2598_v23 }
 0xbbc   : > { %v2609_v46 = vunpack.i.l.bf16 %v2608_v24  ;;  %v2610_v51 = vunpack.i.h.bf16 %v2608_v24 }
 0xbbd   : > { %v3190_v47 = vsel %vm1630_vm0, %v1607_v28, %v2599_v26  ;;  %v3195_v52 = vsel %vm1630_vm0, %v1606_v45, %v2600_v40 }
 0xbbe   : > { %v3200_v58 = vsel %vm1630_vm0, %v1605_v50, %v2609_v46  ;;  %v3205_v60 = vsel %vm1630_vm0, %v1604_v57, %v2610_v51  ;;  %v2626_v57 = vld [vmem:[%s3504_s10] ss:$0 sm:$0xff] }
 0xbc2   : > { %v2603_v41 = vpop.permute.xlu0 %2602 }
 0xbc3   : > { %v2605_v42 = vunpack.i.h.bf16 %v2603_v41  ;;  %v2604_v43 = vunpack.i.l.bf16 %v2603_v41  ;;  %v2613_v44 = vpop.permute.xlu1 %2612 }
 0xbc4   : > { %v2614_v48 = vunpack.i.l.bf16 %v2613_v44  ;;  %v2615_v54 = vunpack.i.h.bf16 %v2613_v44 }
 0xbc5   : > { %v1687_v49 = vsel %vm1683_vm6, %v3190_v47, %v2604_v43  ;;  %v1686_v55 = vsel %vm1683_vm6, %v3195_v52, %v2605_v42 }
 0xbc6   : > { %1717 = vmatpush.msra.mxu0 %v1687_v49  ;;  %2498 = vmatpush.msra.mxu1 %v1687_v49  ;;  %v1685_v59 = vsel %vm1683_vm6, %v3200_v58, %v2614_v48  ;;  %v1684_v62 = vsel %vm1683_vm6, %v3205_v60, %v2615_v54 }
 0xbc7   : > { %1809 = vmatpush.msra.mxu2 %v1687_v49 }
 0xbc8   : > { %1718 = vmatpush.msra.mxu0 %v1686_v55  ;;  %2499 = vmatpush.msra.mxu1 %v1686_v55 }
 0xbc9   : > { %1810 = vmatpush.msra.mxu2 %v1686_v55 }
 0xbca   : > { %1719 = vmatpush.msra.mxu0 %v1685_v59  ;;  %2500 = vmatpush.msra.mxu1 %v1685_v59 }
 0xbcb   : > { %1811 = vmatpush.msra.mxu2 %v1685_v59 }
 0xbcc   : > { %1720 = vmatpush.msra.mxu0 %v1684_v62  ;;  %2501 = vmatpush.msra.mxu1 %v1684_v62 }
 0xbcd   : > { %1812 = vmatpush.msra.mxu2 %v1684_v62  ;;  %2429 = vmatmul.msk.f32.vlgmr.msra.gmra.mxu1 %vm1692_vm7, %v3207_v61 }
 0xbce   : > { %1763 = vmatpush.msrb.mxu1 %v1687_v49  ;;  %2435 = vmatmul.msk.f32.vlgmr.msra.gmra.mxu2 %vm1692_vm7, %v3211_v63 }
 0xbcf   : > { %2427 = vmatmul.msk.f32.vlgmr.msra.gmra.mxu0 %vm1692_vm7, %v3223_v2 }
 0xbd0   : > { %1764 = vmatpush.msrb.mxu1 %v1686_v55 }
 0xbd2   : > { %1765 = vmatpush.msrb.mxu1 %v1685_v59 }
 0xbd4   : > { %1766 = vmatpush.msrb.mxu1 %v1684_v62 }
 0xbd5   : > { %2430 = vmatmul.msk.f32.gmra.mxu1 %vm1692_vm7, %v3217_v0 }
 0xbd6   : > { %2436 = vmatmul.msk.f32.gmra.mxu2 %vm1692_vm7, %v3219_v1 }
 0xbd7   : > { %2428 = vmatmul.msk.f32.gmra.mxu0 %vm1692_vm7, %v3253_v25 }
 0xbdd   : > { %2431 = vmatmul.msk.f32.vlgmr.msrb.gmra.mxu1 %vm1692_vm7, %v3229_v3 }
 0xbde   : > { %2437 = vmatmul.msk.f32.gmra.mxu2 %vm1692_vm7, %v3231_v4 }
 0xbe5   : > { %2432 = vmatmul.msk.f32.gmra.mxu1 %vm1692_vm7, %v3237_v5 }
 0xbe6   : > { %2438 = vmatmul.msk.f32.gmra.mxu2 %vm1692_vm7, %v3239_v15 }
 0xbed   : > { %2433 = vmatmul.msk.f32.gmra.mxu1 %vm1692_vm7, %v3245_v18 }
 0xbf5   : > { %2434 = vmatmul.msk.f32.gmra.mxu1 %vm1692_vm7, %v3249_v22 }
 0xc4a   : > { %v3257_v27 = vpop.f32.mrf.mxu1 }
 0xc4c   : > { %v1722_v23 = vpop.f32.mrf.mxu0 }
 0xc51   : > { %v1814_v29 = vpop.f32.mrf.mxu2 }
 0xc52   : > { %v3259_v30 = vpop.f32.mrf.mxu1 }
 0xc54   : > { %v1725_v40 = vpop.f32.mrf.mxu0 }
 0xc59   : > { %v1817_v35 = vpop.f32.mrf.mxu2 }
 0xc5a   : > { %v1768_v36 = vpop.f32.mrf.mxu1  ;;  %1848 = vrot.lane.b32.xlu1 %v1817_v35, %s2672_s14 }
 0xc5b   : > { %1830 = vrot.lane.b32.xlu2 %v1768_v36, %s2673_s28 }
 0xc61   : > { %v1820_v21 = vpop.f32.mrf.mxu2 }
 0xc62   : > { %v1771_v9 = vpop.f32.mrf.mxu1 }
 0xc63   : > { %1846 = vrot.lane.b32.xlu2 %v1814_v29, %s2672_s14  ;;  %1832 = vrot.lane.b32.xlu0 %v1771_v9, %s2673_s28 }
 0xc69   : > { %v1823_v38 = vpop.f32.mrf.mxu2 }
 0xc6a   : > { %v1774_v12 = vpop.f32.mrf.mxu1 }
 0xc6b   : > { %1850 = vrot.lane.b32.xlu0 %v1820_v21, %s2672_s14  ;;  %1834 = vrot.lane.b32.xlu2 %v1774_v12, %s2673_s28 }
 0xc72   : > { %v1777_v16 = vpop.f32.mrf.mxu1 }
 0xc73   : > { %1836 = vrot.lane.b32.xlu1 %v1777_v16, %s2673_s28  ;;  %1852 = vrot.lane.b32.xlu2 %v1823_v38, %s2672_s14 }
 0xcb5   : > { %v1831_v20 = vpop.permute.xlu2 %1830 }
 0xcb6   : > { %v1859_v24 = vsel %vm1858_vm9, %v1722_v23, %v1831_v20 }
 0xcbd   : > { %v1847_v26 = vpop.permute.xlu2 %1846 }
 0xcbe   : > { %v1864_v28 = vsel %vm1863_vm10, %v1859_v24, %v1847_v26 }
 0xcbf   : > { %2440 = vmatmul.msk.f32.vlgmr.msra.gmra.mxu3 %vm1871_vm11, %v1864_v28 }
 0xcc5   : > { %v1835_v45 = vpop.permute.xlu2 %1834 }
 0xcc6   : > { %v1861_v46 = vsel %vm1858_vm9, %v3257_v27, %v1835_v45 }
 0xccc   : > { %v1849_v41 = vpop.permute.xlu1 %1848 }
 0xccd   : > { %v1853_v50 = vpop.permute.xlu2 %1852 }
 0xcd5   : > { %v1833_v42 = vpop.permute.xlu0 %1832 }
 0xcd6   : > { %v1860_v43 = vsel %vm1858_vm9, %v1725_v40, %v1833_v42 }
 0xcd7   : > { %v1865_v44 = vsel %vm1863_vm10, %v1860_v43, %v1849_v41 }
 0xcd8   : > { %2441 = vmatmul.msk.f32.gmra.mxu3 %vm1871_vm11, %v1865_v44 }
 0xcdd   : > { %v1851_v48 = vpop.permute.xlu0 %1850 }
 0xcde   : > { %v1866_v49 = vsel %vm1863_vm10, %v1861_v46, %v1851_v48 }
 0xce0   : > { %2442 = vmatmul.msk.f32.gmra.mxu3 %vm1871_vm11, %v1866_v49 }
 0xce5   : > { %v1837_v51 = vpop.permute.xlu1 %1836 }
 0xce6   : > { %v1862_v54 = vsel %vm1858_vm9, %v3259_v30, %v1837_v51 }
 0xce7   : > { %v1867_v55 = vsel %vm1863_vm10, %v1862_v54, %v1853_v50 }
 0xce8   : > { %2443 = vmatmul.msk.f32.gmra.mxu3 %vm1871_vm11, %v1867_v55 }
 0xd42   : > { %v1905_v59 = vpop.f32.mrf.mxu3 }
 0xd43   : > { %v1906_v62 = vadd.f32 %v2626_v57, %v1905_v59 }
 0xd45   : > { %v2444_v27 = vmul.f32 -1.442695, %v1906_v62 }
 0xd47   : > { %2629 = vpow2.f32 %v2444_v27 }
 0xd4d   : > { %v2630_v29 = vpop.eup %2629 }
 0xd4e   : > { %v1929_v31 = vadd.f32 1.0, %v2630_v29 }
 0xd50   : > { %2631 = vrcp.f32 %v1929_v31  ;;  %v1944_v20 = vand.u32 2147483648, %v1929_v31  ;;  %vm1938_vm3 = vweird.f32 %v1929_v31  ;;  %v1942_v24 = vand.u32 2147483647, %v1929_v31 }
 0xd52   : > { %v1945_v42 = vor.u32 1.1754944e-38, %v1944_v20  ;;  %vm1943_vm12 = vcmp.eq.f32.partialorder %v1942_v24, 8.507059e+37 }
 0xd56   : > { %v2632_v30 = vpop.eup %2631 }
 0xd57   : > { %v1934_v53 = vmul.f32 %v2632_v30, %v1929_v31  ;;  %vm1939_vm1 = vweird.f32 %v2632_v30 }
 0xd58   : > { %vm1940_vm4 = vmor %vm1938_vm3, %vm1939_vm1 }
 0xd59   : > { %v1935_v9 = vsub.f32 1.0, %v1934_v53 }
 0xd5b   : > { %v1908_v32 = vpop.f32.mrf.mxu3  ;;  %v1936_v38 = vmul.f32 %v2632_v30, %v1935_v9 }
 0xd5c   : > { %v1909_v33 = vadd.f32 %v2626_v57, %v1908_v32 }
 0xd5d   : > { %v1937_v19 = vadd.f32 %v2632_v30, %v1936_v38 }
 0xd5e   : > { %v2445_v34 = vmul.f32 -1.442695, %v1909_v33 }
 0xd5f   : > { %v1941_v28 = vsel %vm1940_vm4, %v2632_v30, %v1937_v19 }
 0xd60   : > { %2633 = vpow2.f32 %v2445_v34  ;;  %v3326_v48 = vsel %vm1943_vm12, %v1945_v42, %v1941_v28  ;;  %v1652_v42 = vld [vmem:[%s3505_s11 + $0x18] sm:$0xff] }
 0xd63   : > { %v1911_v35 = vpop.f32.mrf.mxu3 }
 0xd64   : > { %v1912_v36 = vadd.f32 %v2626_v57, %v1911_v35 }
 0xd66   : > { %v2634_v37 = vpop.eup %2633  ;;  %v2446_v11 = vmul.f32 -1.442695, %v1912_v36 }
 0xd67   : > { %v1930_v8 = vadd.f32 1.0, %v2634_v37 }
 0xd68   : > { %2635 = vpow2.f32 %v2446_v11 }
 0xd69   : > { %2637 = vrcp.f32 %v1930_v8  ;;  %v1959_v26 = vand.u32 2147483648, %v1930_v8  ;;  %v1957_v41 = vand.u32 2147483647, %v1930_v8  ;;  %vm1953_vm13 = vweird.f32 %v1930_v8 }
 0xd6b   : > { %v1914_v21 = vpop.f32.mrf.mxu3  ;;  %v1960_v49 = vor.u32 1.1754944e-38, %v1959_v26  ;;  %vm1958_vm2 = vcmp.eq.f32.partialorder %v1957_v41, 8.507059e+37 }
 0xd6c   : > { %v1915_v12 = vadd.f32 %v2626_v57, %v1914_v21  ;;  %v1993_v57 = vmul.f32 %v3326_v48, %v3179_v14 }
 0xd6e   : > { %v2636_v16 = vpop.eup %2635  ;;  %v2447_v56 = vmul.f32 -1.442695, %v1915_v12 }
 0xd6f   : > { %v2638_v39 = vpop.eup %2637  ;;  %v1931_v6 = vadd.f32 1.0, %v2636_v16 }
 0xd70   : > { %v1949_v7 = vmul.f32 %v2638_v39, %v1930_v8  ;;  %2639 = vpow2.f32 %v2447_v56  ;;  %vm1954_vm5 = vweird.f32 %v2638_v39 }
 0xd71   : > { %2641 = vrcp.f32 %v1931_v6  ;;  %vm1955_vm14 = vmor %vm1953_vm13, %vm1954_vm5  ;;  %v1974_v33 = vand.u32 2147483648, %v1931_v6  ;;  %vm1968_vm1 = vweird.f32 %v1931_v6  ;;  %v1972_v30 = vand.u32 2147483647, %v1931_v6 }
 0xd72   : > { %v1950_v23 = vsub.f32 1.0, %v1949_v7 }
 0xd73   : > { %v1975_v11 = vor.u32 1.1754944e-38, %v1974_v33  ;;  %vm1973_vm5 = vcmp.eq.f32.partialorder %v1972_v30, 8.507059e+37 }
 0xd74   : > { %v1951_v40 = vmul.f32 %v2638_v39, %v1950_v23 }
 0xd76   : > { %v2640_v43 = vpop.eup %2639  ;;  %v1952_v44 = vadd.f32 %v2638_v39, %v1951_v40 }
 0xd77   : > { %v2642_v45 = vpop.eup %2641  ;;  %v1932_v46 = vadd.f32 1.0, %v2640_v43  ;;  %v1651_v43 = vld [vmem:[%s3505_s11 + $0x10] sm:$0xff] }
 0xd78   : > { %v1964_v50 = vmul.f32 %v2642_v45, %v1931_v6  ;;  %v1956_v51 = vsel %vm1955_vm14, %v2638_v39, %v1952_v44  ;;  %vm1969_vm15 = vweird.f32 %v2642_v45  ;;  %v1650_v44 = vld [vmem:[%s3505_s11 + $0x8] sm:$0xff] }
 0xd79   : > { %2643 = vrcp.f32 %v1932_v46  ;;  %v3328_v54 = vsel %vm1958_vm2, %v1960_v49, %v1956_v51  ;;  %vm1970_vm3 = vmor %vm1968_vm1, %vm1969_vm15  ;;  %v1989_v35 = vand.u32 2147483648, %v1932_v46  ;;  %v1987_v37 = vand.u32 2147483647, %v1932_v46 }
 0xd7a   : > { %v1965_v55 = vsub.f32 1.0, %v1964_v50  ;;  %v1994_v59 = vmul.f32 %v3328_v54, %v3181_v17  ;;  %vm1983_vm12 = vweird.f32 %v1932_v46 }
 0xd7b   : > { %v1990_v21 = vor.u32 1.1754944e-38, %v1989_v35  ;;  %vm1988_vm14 = vcmp.eq.f32.partialorder %v1987_v37, 8.507059e+37 }
 0xd7c   : > { %v2621_v62 = vpack.i.bf16 %v1993_v57, %v1994_v59  ;;  %v1966_v27 = vmul.f32 %v2642_v45, %v1965_v55 }
 0xd7e   : > { %2622 = vrot.lane.b32.xlu1 %v2621_v62, %s2671_s21  ;;  %v1967_v32 = vadd.f32 %v2642_v45, %v1966_v27 }
 0xd7f   : > { %v2644_v29 = vpop.eup %2643 }
 0xd80   : > { %v1979_v31 = vmul.f32 %v2644_v29, %v1932_v46  ;;  %v1971_v53 = vsel %vm1970_vm3, %v2642_v45, %v1967_v32  ;;  %vm1984_vm4 = vweird.f32 %v2644_v29  ;;  %v1649_v46 = vld [vmem:[%s3505_s11] sm:$0xff] }
 0xd81   : > { %v3335_v9 = vsel %vm1973_vm5, %v1975_v11, %v1971_v53  ;;  %vm1985_vm13 = vmor %vm1983_vm12, %vm1984_vm4  ;;  %v2627_v11 = vld [vmem:[%s3506_s12] ss:$0 sm:$0xff] }
 0xd82   : > { %v1980_v34 = vsub.f32 1.0, %v1979_v31  ;;  %v1995_v16 = vmul.f32 %v3335_v9, %v3175_v10 }
 0xd84   : > { %v1981_v36 = vmul.f32 %v2644_v29, %v1980_v34 }
 0xd86   : > { %v1982_v8 = vadd.f32 %v2644_v29, %v1981_v36 }
 0xd88   : > { %v1986_v12 = vsel %vm1985_vm13, %v2644_v29, %v1982_v8 }
 0xd89   : > { %v3337_v38 = vsel %vm1988_vm14, %v1990_v21, %v1986_v12 }
 0xd8a   : > { %v1996_v56 = vmul.f32 %v3337_v38, %v3177_v13 }
 0xd8c   : > { %v2616_v39 = vpack.i.bf16 %v1995_v16, %v1996_v56 }
 0xd8e   : > { %2617 = vrot.lane.b32.xlu0 %v2616_v39, %s2671_s21  ;;  %s2674_s21 = smov 32  }
 0xdf0   : > { %v2623_v6 = vpop.permute.xlu1 %2622 }
 0xdf1   : > { %v2624_v23 = vunpack.i.l.bf16 %v2623_v6  ;;  %v2625_v26 = vunpack.i.h.bf16 %v2623_v6 }
 0xdf3   : > { %v2014_v40 = vsel %vm1683_vm6, %v3200_v58, %v2624_v23  ;;  %v2013_v41 = vsel %vm1683_vm6, %v3205_v60, %v2625_v26  ;;  %v1661_v60 = vld [vmem:[%s3505_s11 + $0x60] sm:$0x3f] }
 0xdf4   : > { %2460 = vmatpush.msk.msrb.mxu3 %vm1884_vm8, %v1661_v60 }
 0xe00   : > { %v2618_v7 = vpop.permute.xlu0 %2617 }
 0xe01   : > { %v2620_v19 = vunpack.i.h.bf16 %v2618_v7  ;;  %v2619_v20 = vunpack.i.l.bf16 %v2618_v7 }
 0xe03   : > { %v2016_v24 = vsel %vm1683_vm6, %v3190_v47, %v2619_v20  ;;  %v2015_v28 = vsel %vm1683_vm6, %v3195_v52, %v2620_v19 }
 0xe04   : > { %2029 = vmatpush.msrb.mxu0 %v2016_v24  ;;  %2058 = vmatpush.msra.mxu1 %v2016_v24 }
 0xe05   : > { %2087 = vmatpush.msrb.mxu2 %v2016_v24 }
 0xe06   : > { %2030 = vmatpush.msrb.mxu0 %v2015_v28  ;;  %2059 = vmatpush.msra.mxu1 %v2015_v28 }
 0xe07   : > { %2088 = vmatpush.msrb.mxu2 %v2015_v28  ;;  %v2211_v28 = vsub.f32 1.0, %v3326_v48 }
 0xe08   : > { %2031 = vmatpush.msrb.mxu0 %v2014_v40  ;;  %2060 = vmatpush.msra.mxu1 %v2014_v40 }
 0xe09   : > { %2089 = vmatpush.msrb.mxu2 %v2014_v40 }
 0xe0a   : > { %2032 = vmatpush.msrb.mxu0 %v2013_v41  ;;  %2061 = vmatpush.msra.mxu1 %v2013_v41 }
 0xe0b   : > { %2090 = vmatpush.msrb.mxu2 %v2013_v41  ;;  %2452 = vmatmul.msk.f32.vlgmr.msra.gmra.mxu1 %vm1692_vm7, %v3229_v3 }
 0xe0c   : > { %2456 = vmatmul.msk.f32.vlgmr.msrb.gmra.mxu2 %vm1692_vm7, %v3211_v63  ;;  %2448 = vmatmul.msk.f32.vlgmr.msrb.gmra.mxu0 %vm1692_vm7, %v3223_v2  ;;  %v1659_v63 = vld [vmem:[%s3505_s11 + $0x50] sm:$0xff] }
 0xe13   : > { %2453 = vmatmul.msk.f32.gmra.mxu1 %vm1692_vm7, %v3237_v5  ;;  %v1655_v5 = vld [vmem:[%s3505_s11 + $0x30] sm:$0xff] }
 0xe14   : > { %2457 = vmatmul.msk.f32.gmra.mxu2 %vm1692_vm7, %v3219_v1  ;;  %2449 = vmatmul.msk.f32.gmra.mxu0 %vm1692_vm7, %v3253_v25  ;;  %v1657_v1 = vld [vmem:[%s3505_s11 + $0x40] sm:$0xff] }
 0xe1b   : > { %2454 = vmatmul.msk.f32.gmra.mxu1 %vm1692_vm7, %v3245_v18  ;;  %v1653_v18 = vld [vmem:[%s3505_s11 + $0x20] sm:$0xff] }
 0xe1c   : > { %2458 = vmatmul.msk.f32.gmra.mxu2 %vm1692_vm7, %v3231_v4  ;;  %2450 = vmatmul.msk.f32.gmra.mxu0 %vm1692_vm7, %v3207_v61  ;;  %v1660_v61 = vld [vmem:[%s3505_s11 + $0x58] sm:$0xff] }
 0xe1d   : > { %2166 = vmatpush.msrb.mxu3 %v1660_v61  ;;  %v1656_v4 = vld [vmem:[%s3505_s11 + $0x38] sm:$0xff] }
 0xe1f   : > { %2167 = vmatpush.msrb.mxu3 %v1659_v63  ;;  %v2212_v63 = vsub.f32 1.0, %v3328_v54 }
 0xe23   : > { %2455 = vmatmul.msk.f32.gmra.mxu1 %vm1692_vm7, %v3249_v22 }
 0xe24   : > { %2459 = vmatmul.msk.f32.gmra.mxu2 %vm1692_vm7, %v3239_v15  ;;  %2451 = vmatmul.msk.f32.gmra.mxu0 %vm1692_vm7, %v3217_v0  ;;  %v1658_v0 = vld [vmem:[%s3505_s11 + $0x48] sm:$0xff] }
 0xe25   : > { %2168 = vmatpush.msrb.mxu3 %v1658_v0  ;;  %v1654_v15 = vld [vmem:[%s3505_s11 + $0x28] sm:$0xff] }
 0xe27   : > { %2169 = vmatpush.msrb.mxu3 %v1657_v1 }
 0xe29   : > { %2170 = vmatpush.msrb.mxu3 %v1656_v4 }
 0xe2b   : > { %2171 = vmatpush.msrb.mxu3 %v1655_v5  ;;  %v2214_v5 = vsub.f32 1.0, %v3337_v38 }
 0xe2d   : > { %2172 = vmatpush.msrb.mxu3 %v1654_v15  ;;  %v2213_v15 = vsub.f32 1.0, %v3335_v9 }
 0xe2f   : > { %2173 = vmatpush.msrb.mxu3 %v1653_v18 }
 0xe31   : > { %2174 = vmatpush.msrb.mxu3 %v1652_v42 }
 0xe33   : > { %2175 = vmatpush.msrb.mxu3 %v1651_v43 }
 0xe35   : > { %2176 = vmatpush.msrb.mxu3 %v1650_v44 }
 0xe37   : > { %2177 = vmatpush.msrb.mxu3 %v1649_v46 }
 0xe88   : > { %v2063_v47 = vpop.f32.mrf.mxu1 }
 0xe89   : > { %2108 = vrot.lane.b32.xlu2 %v2063_v47, %s2673_s28  ;;  %v2034_v49 = vpop.f32.mrf.mxu0 }
 0xe8f   : > { %v2092_v52 = vpop.f32.mrf.mxu2 }
 0xe90   : > { %2124 = vrot.lane.b32.xlu0 %v2092_v52, %s2672_s14  ;;  %v2066_v58 = vpop.f32.mrf.mxu1  ;;  %v2261_v52 = vld [vmem:[%s3507_s13 + $0x10] sm:$0xff] }
 0xe91   : > { %2110 = vrot.lane.b32.xlu1 %v2066_v58, %s2673_s28  ;;  %v2037_v51 = vpop.f32.mrf.mxu0  ;;  %v2260_v58 = vld [vmem:[%s3507_s13 + $0x8] sm:$0xff] }
 0xe97   : > { %v2095_v2 = vpop.f32.mrf.mxu2 }
 0xe98   : > { %v2069_v3 = vpop.f32.mrf.mxu1  ;;  %2126 = vrot.lane.b32.xlu2 %v2095_v2, %s2672_s14 }
 0xe99   : > { %2112 = vrot.lane.b32.xlu0 %v2069_v3, %s2673_s28  ;;  %v2040_v29 = vpop.f32.mrf.mxu0 }
 0xe9f   : > { %v2098_v22 = vpop.f32.mrf.mxu2 }
 0xea0   : > { %2128 = vrot.lane.b32.xlu1 %v2098_v22, %s2672_s14  ;;  %v2072_v25 = vpop.f32.mrf.mxu1 }
 0xea1   : > { %2114 = vrot.lane.b32.xlu2 %v2072_v25, %s2673_s28  ;;  %v2043_v35 = vpop.f32.mrf.mxu0 }
 0xea7   : > { %v2101_v45 = vpop.f32.mrf.mxu2 }
 0xea8   : > { %2195 = vrot.lane.b32.xlu1 %v3179_v14, %s2674_s21  ;;  %2130 = vrot.lane.b32.xlu0 %v2101_v45, %s2672_s14 }
 0xeb0   : > { %2197 = vrot.lane.b32.xlu0 %v3181_v17, %s2674_s21 }
 0xee3   : > { %v2109_v50 = vpop.permute.xlu2 %2108 }
 0xee4   : > { %v2136_v55 = vsel %vm1858_vm9, %v2034_v49, %v2109_v50 }
 0xef2   : > { %v2127_v27 = vpop.permute.xlu2 %2126 }
 0xefb   : > { %v2115_v30 = vpop.permute.xlu2 %2114 }
 0xefc   : > { %v2139_v53 = vsel %vm1858_vm9, %v2043_v35, %v2115_v30 }
 0xf02   : > { %v2125_v57 = vpop.permute.xlu0 %2124 }
 0xf03   : > { %v2140_v59 = vsel %vm1863_vm10, %v2136_v55, %v2125_v57  ;;  %v2111_v62 = vpop.permute.xlu1 %2110 }
 0xf04   : > { %2461 = vmatmul.msk.f32.vlgmr.msrb.gmra.mxu3 %vm1871_vm11, %v2140_v59  ;;  %v2137_v14 = vsel %vm1858_vm9, %v2037_v51, %v2111_v62 }
 0xf05   : > { %v2141_v17 = vsel %vm1863_vm10, %v2137_v14, %v2127_v27 }
 0xf0b   : > { %v2113_v31 = vpop.permute.xlu0 %2112 }
 0xf0c   : > { %2462 = vmatmul.msk.f32.gmra.mxu3 %vm1871_vm11, %v2141_v17  ;;  %v2138_v32 = vsel %vm1858_vm9, %v2040_v29, %v2113_v31 }
 0xf12   : > { %v2129_v33 = vpop.permute.xlu1 %2128 }
 0xf13   : > { %v2142_v34 = vsel %vm1863_vm10, %v2138_v32, %v2129_v33 }
 0xf14   : > { %2463 = vmatmul.msk.f32.gmra.mxu3 %vm1871_vm11, %v2142_v34 }
 0xf1a   : > { %v2131_v36 = vpop.permute.xlu0 %2130  ;;  %v2196_v26 = vpop.permute.xlu1 %2195 }
 0xf1b   : > { %v2143_v37 = vsel %vm1863_vm10, %v2139_v53, %v2131_v36 }
 0xf1c   : > { %2464 = vmatmul.msk.f32.gmra.mxu3 %vm1871_vm11, %v2143_v37 }
 0xf22   : > { %v2198_v60 = vpop.permute.xlu0 %2197 }
 0xf23   : > { %v2208_v1 = vmul.f32 %v2198_v60, %v3328_v54 }
 0xf87   : > { %v2179_v8 = vpop.f32.mrf.mxu3 }
 0xf88   : > { %v2180_v21 = vadd.f32 %v2627_v11, %v2179_v8 }
 0xf8a   : > { %2645 = vtanh.f32 %v2180_v21 }
 0xf8f   : > { %v2182_v12 = vpop.f32.mrf.mxu3 }
 0xf90   : > { %v2646_v16 = vpop.eup %2645  ;;  %v2183_v56 = vadd.f32 %v2627_v11, %v2182_v12 }
 0xf91   : > { %2219 = vrot.lane.b32.xlu2 %v2646_v16, %s2674_s21 }
 0xf92   : > { %2647 = vtanh.f32 %v2183_v56 }
 0xf97   : > { %v2185_v39 = vpop.f32.mrf.mxu3 }
 0xf98   : > { %v2648_v6 = vpop.eup %2647  ;;  %v2186_v7 = vadd.f32 %v2627_v11, %v2185_v39 }
 0xf99   : > { %2199 = vrot.lane.b32.xlu2 %v3175_v10, %s2674_s21  ;;  %2221 = vrot.lane.b32.xlu1 %v2648_v6, %s2674_s21  ;;  %v2207_v10 = vmul.f32 %v2196_v26, %v3326_v48  ;;  %v2259_v48 = vld [vmem:[%s3507_s13] sm:$0xff] }
 0xf9a   : > { %2649 = vtanh.f32 %v2186_v7 }
 0xf9f   : > { %v2188_v19 = vpop.f32.mrf.mxu3 }
 0xfa0   : > { %v2650_v20 = vpop.eup %2649  ;;  %v2189_v23 = vadd.f32 %v2627_v11, %v2188_v19 }
 0xfa1   : > { %2201 = vrot.lane.b32.xlu1 %v3177_v13, %s2674_s21  ;;  %2223 = vrot.lane.b32.xlu0 %v2650_v20, %s2674_s21  ;;  %v2262_v13 = vld [vmem:[%s3507_s13 + $0x18] sm:$0xff] }
 0xfa2   : > { %2651 = vtanh.f32 %v2189_v23  ;;  %2287 = vmatpush.msra.mxu0 %v2262_v13 }
 0xfa4   : > { %2288 = vmatpush.msra.mxu0 %v2261_v52 }
 0xfa6   : > { %2289 = vmatpush.msra.mxu0 %v2260_v58 }
 0xfa8   : > { %v2652_v24 = vpop.eup %2651  ;;  %2290 = vmatpush.msra.mxu0 %v2259_v48 }
 0xfa9   : > { %2225 = vrot.lane.b32.xlu2 %v2652_v24, %s2674_s21 }
 0xfeb   : > { %v2220_v40 = vpop.permute.xlu2 %2219 }
 0xfec   : > { %v2231_v41 = vmul.f32 %v2220_v40, %v2211_v28 }
 0xfee   : > { %v2235_v47 = vadd.f32 %v2231_v41, %v2207_v10 }
 0xff0   : > { %2243 = vrot.lane.b32.xlu0 %v2235_v47, %s2675_s26 }
 0xff3   : > { %v2200_v61 = vpop.permute.xlu2 %2199 }
 0xff4   : > { %v2209_v25 = vmul.f32 %v2200_v61, %v3335_v9 }
0x1003   : > { %v2226_v4 = vpop.permute.xlu2 %2225 }
0x1004   : > { %v2234_v42 = vmul.f32 %v2226_v4, %v2214_v5 }
0x100b   : > { %v2222_v0 = vpop.permute.xlu1 %2221 }
0x100c   : > { %v2232_v2 = vmul.f32 %v2222_v0, %v2212_v63 }
0x100e   : > { %v2236_v3 = vadd.f32 %v2232_v2, %v2208_v1 }
0x1010   : > { %2245 = vrot.lane.b32.xlu1 %v2236_v3, %s2675_s26 }
0x1013   : > { %v2202_v18 = vpop.permute.xlu1 %2201  ;;  %v2224_v22 = vpop.permute.xlu0 %2223 }
0x1014   : > { %v2210_v43 = vmul.f32 %v2202_v18, %v3337_v38  ;;  %v2233_v44 = vmul.f32 %v2224_v22, %v2213_v15  ;;  %v2628_v38 = vld [vmem:[#allocation5] ss:$0 sm:$0xff] }
0x1016   : > { %v2238_v45 = vadd.f32 %v2234_v42, %v2210_v43  ;;  %v2237_v46 = vadd.f32 %v2233_v44, %v2209_v25 }
0x1018   : > { %2247 = vrot.lane.b32.xlu2 %v2237_v46, %s2675_s26  ;;  %2249 = vrot.lane.b32.xlu0 %v2238_v45, %s2675_s26 }
0x1062   : > { %v2244_v54 = vpop.permute.xlu0 %2243 }
0x1063   : > { %2255 = vst.msk [vmem:[#allocation3] sm:$0xff] %vm1692_vm7, %v2244_v54  ;;  %2465 = vmatmul.msk.f32.vlgmr.msra.gmra.mxu0 %vm1692_vm7, %v2244_v54 }
0x1072   : > { %v2248_v49 = vpop.permute.xlu2 %2247 }
0x1073   : > { %2257 = vst.msk [vmem:[#allocation3 + $0x10] sm:$0xff] %vm1692_vm7, %v2248_v49 }
0x1082   : > { %v2246_v50 = vpop.permute.xlu1 %2245 }
0x1083   : > { %2256 = vst.msk [vmem:[#allocation3 + $0x8] sm:$0xff] %vm1692_vm7, %v2246_v50  ;;  %2466 = vmatmul.msk.f32.gmra.mxu0 %vm1692_vm7, %v2246_v50 }
0x108a   : > { %v2250_v9 = vpop.permute.xlu0 %2249 }
0x108b   : > { %2258 = vst.msk [vmem:[#allocation3 + $0x18] sm:$0xff] %vm1692_vm7, %v2250_v9  ;;  %2467 = vmatmul.msk.f32.gmra.mxu0 %vm1692_vm7, %v2248_v49 }
0x1093   : > { %2468 = vmatmul.msk.f32.gmra.mxu0 %vm1692_vm7, %v2250_v9 }
0x10e0   : > { %v2292_v51 = vpop.f32.mrf.mxu0 }
0x10e1   : > { %v2293_v55 = vadd.f32 %v2628_v38, %v2292_v51 }
0x10e3   : > { %2304 = vst.msk [vmem:[#allocation4] sm:$0xff] %vm1630_vm0, %v2293_v55 }
0x10e4   : > { %2309 = vst.msk [vmem:[%s2308_s24] sm:$0xff] %vm1630_vm0, %v2293_v55 }
0x1100   : > { %v2295_v57 = vpop.f32.mrf.mxu0 }
0x1101   : > { %v2296_v59 = vadd.f32 %v2628_v38, %v2295_v57 }
0x1103   : > { %2305 = vst.msk [vmem:[#allocation4 + $0x8] sm:$0xff] %vm1630_vm0, %v2296_v59 }
0x1104   : > { %2310 = vst.msk [vmem:[%s2308_s24 + $0x8] sm:$0xff] %vm1630_vm0, %v2296_v59 }
0x1108   : > { %v2298_v62 = vpop.f32.mrf.mxu0 }
0x1109   : > { %v2299_v14 = vadd.f32 %v2628_v38, %v2298_v62 }
0x110b   : > { %2306 = vst.msk [vmem:[#allocation4 + $0x10] sm:$0xff] %vm1630_vm0, %v2299_v14 }
0x110c   : > { %2311 = vst.msk [vmem:[%s2308_s24 + $0x10] sm:$0xff] %vm1630_vm0, %v2299_v14 }
0x1110   : > { %v2301_v27 = vpop.f32.mrf.mxu0 }
0x1111   : > { %v2302_v17 = vadd.f32 %v2628_v38, %v2301_v27 }
0x1113   : > { %2307 = vst.msk [vmem:[#allocation4 + $0x18] sm:$0xff] %vm1630_vm0, %v2302_v17 }
0x1114   : > { %2312 = vst.msk [vmem:[%s2308_s24 + $0x18] sm:$0xff] %vm1630_vm0, %v2302_v17 }
0x1115 PF: > { %s27_s20 = sadd.s32 1, %s2659_s20  }
0x1116   : > { %p24_p7 = scmp.ge.s32.totalorder %s27_s20, 13  }
0x1118   :  { %26 = sbr.rel (!%p24_p7) target bundleno = 3 (0x3), region = 130 }

</bundles_post_ra>
